<compile_context>
chip_gen: v5e
topology: v5e:2x2
jax: 0.10.0
libtpu: 0.0.40
codegen_flags: <defaults>
</compile_context>

<pallas_src>
import math
import functools

import jax
import jax.numpy as jnp
from jax.experimental import pallas as pl
from jax.experimental.pallas import tpu as pltpu


# --------------------------------------------------------------------------
# Kernel 1: fused Q / (K|V) projection.
#   Q is pre-scaled by 1/sqrt(df); K and V come out of ONE matmul against the
#   concatenated weight (F, 2F) and are written transposed as (2F, t_tok) so
#   kernel 2's context strips are lane-dense.
# --------------------------------------------------------------------------
def qkv_project_kernel(x_ref, c_ref, wq_ref, bq_ref, wkv_ref, bkv_ref,
                       q_ref, kvT_ref, *, scale):
    x = x_ref[...].astype(jnp.float32)                  # (t_tok, F)
    c = c_ref[...].astype(jnp.float32)                  # (t_tok, F)

    q = jnp.dot(x, wq_ref[...], preferred_element_type=jnp.float32) + bq_ref[...]
    q_ref[...] = (q * scale).astype(q_ref.dtype)        # fold softmax scale into Q

    kv = jnp.dot(c, wkv_ref[...], preferred_element_type=jnp.float32) + bkv_ref[...]
    kvT_ref[...] = kv.T.astype(kvT_ref.dtype)           # (2F, t_tok): rows [0:F]=K^T, [F:2F]=V^T


# --------------------------------------------------------------------------
# Kernel 2: per-feature softmax attention with an exact, precomputed max.
#   grid = (num_query_tiles, num_context_blocks); context axis is a reduction.
#   Inside each context block we unroll a static loop over lane-dense strips.
# --------------------------------------------------------------------------
def feature_attention_kernel(q_ref, kvT_ref, kext_ref, o_ref, l_sc, acc_sc,
                             *, feat, strip, n_strips):
    kv_step = pl.program_id(1)

    @pl.when(kv_step == 0)
    def _init():
        l_sc[...] = jnp.zeros(l_sc.shape, jnp.float32)
        acc_sc[...] = jnp.zeros(acc_sc.shape, jnp.float32)

    q = q_ref[...].astype(jnp.float32)                   # (tq, F), already scaled
    kext = kext_ref[...].astype(jnp.float32)             # (2, F): row0 = kmax, row1 = kmin
    # Exact per-(i,f) row max of the scores: attained at a K extremum.
    m = jnp.maximum(q * kext[0:1, :], q * kext[1:2, :])  # (tq, F)

    q3 = q[:, :, None]                                   # hoisted out of the strip loop
    m3 = m[:, :, None]

    l = l_sc[...]
    acc = acc_sc[...]
    # Static, unrolled strip loop (n_strips <= 8 by construction): per-strip
    # temps are (tq, F, strip) and never the full (tq, F, tk_block) tensor.
    for s in range(n_strips):
        c0 = s * strip
        kT = kvT_ref[pl.ds(0, feat), pl.ds(c0, strip)].astype(jnp.float32)     # (F, strip)
        vT = kvT_ref[pl.ds(feat, feat), pl.ds(c0, strip)].astype(jnp.float32)  # (F, strip)
        p = jnp.exp(q3 * kT[None, :, :] - m3)             # (tq, F, strip), <= 1
        l = l + jnp.sum(p, axis=-1)
        acc = acc + jnp.sum(p * vT[None, :, :], axis=-1)
    l_sc[...] = l
    acc_sc[...] = acc

    @pl.when(kv_step == pl.num_programs(1) - 1)
    def _finalize():
        # EUP approximate reciprocal (separate VLIW slot); ~1e-3 rel error,
        # covered by the test tolerance.
        inv = pl.reciprocal(l_sc[...], approx=True)
        o_ref[...] = (acc_sc[...] * inv).astype(o_ref.dtype)


# --------------------------------------------------------------------------
# Tile sizing helpers (v7x-safe: keep the 3D temps small, feed both cores).
# --------------------------------------------------------------------------
def _vmem_limit_bytes():
    try:
        cap = int(pltpu.get_tpu_info().vmem_capacity_bytes)
    except Exception:
        cap = 64 * 2**20                      # v7x per-core VMEM
    return int(min(max(cap - 16 * 2**20, 32 * 2**20), 96 * 2**20))


def _divisors(n):
    return [d for d in range(1, n + 1) if n % d == 0]


def _choose_token_tile(N):
    # kvT output block is (2F, t_tok): t_tok sits in lanes -> it must be a
    # multiple of 128 or the full extent N.  Prefer >=2 grid steps (megacore).
    if N % 128 == 0:
        for t in (512, 256, 128):
            if N % t == 0 and N // t >= 2:
                return t
    return N


def _choose_query_tile(N, F):
    # Cap tq*F <= 4096 so the per-strip (tq, F, strip<=512) f32 temp stays in
    # the low-MiB range (internal scratch, NOT bounded by vmem_limit_bytes).
    cap = max(8, 4096 // max(F, 1))
    cands = [d for d in _divisors(N) if d % 8 == 0 and d <= cap]
    if not cands:
        return N
    for min_steps in (4, 2, 1):               # prefer >=4 steps for load balance
        pool = [d for d in cands if N // d >= min_steps]
        if pool:
            return max(pool)
    return max(cands)


def _choose_context_tiles(N, F, tq):
    """Return (tk_block, strip): context block per grid step (lane dim of the
    (2F, tk_block) K|V slab) and the in-kernel static strip width."""
    if N % 128 != 0:
        return N, N                           # small / irregular N: one chunk
    strip = 128                               # lane-dense strips
    while (strip * 2 <= 512 and N % (strip * 2) == 0
           and tq * F * (strip * 2) * 4 <= 2 * 2**20):
        strip *= 2
    best = strip
    for d in _divisors(N):
        if (d % strip == 0 and d // strip <= 8            # static unrolled loop
                and 2 * (2 * F * d * 4) <= 24 * 2**20     # double-buffered slab
                and d > best):
            best = d
    return best, strip


# --------------------------------------------------------------------------
# Forward pass.
# --------------------------------------------------------------------------
def _forward(x2, c2, params, n_head):
    N, F = x2.shape
    df = F // n_head
    scale = 1.0 / math.sqrt(df)

    wq, bq, wk, bk, wv, bv = params
    wq_t = wq.T                                            # (F, F)
    wkv_t = jnp.concatenate([wk.T, wv.T], axis=1)          # (F, 2F): K|V fused
    bq2 = bq.reshape(1, F)
    bkv2 = jnp.concatenate([bk, bv]).reshape(1, 2 * F)

    vmem_limit = _vmem_limit_bytes()

    # ---- kernel 1: fused QKV projection --------------------------------
    t_tok = _choose_token_tile(N)
    q_s, kvT = pl.pallas_call(
        functools.partial(qkv_project_kernel, scale=scale),
        out_shape=(jax.ShapeDtypeStruct((N, F), jnp.float32),      # scaled Q
                   jax.ShapeDtypeStruct((2 * F, N), jnp.float32)), # K^T | V^T
        grid=(N // t_tok,),
        in_specs=[
            pl.BlockSpec((t_tok, F), lambda i: (i, 0)),            # x tile
            pl.BlockSpec((t_tok, F), lambda i: (i, 0)),            # c tile
            pl.BlockSpec((F, F), lambda i: (0, 0)),                # Wq^T
            pl.BlockSpec((1, F), lambda i: (0, 0)),                # bq
            pl.BlockSpec((F, 2 * F), lambda i: (0, 0)),            # Wk^T|Wv^T
            pl.BlockSpec((1, 2 * F), lambda i: (0, 0)),            # bk|bv
        ],
        out_specs=(
            pl.BlockSpec((t_tok, F), lambda i: (i, 0)),
            pl.BlockSpec((2 * F, t_tok), lambda i: (0, i)),
        ),
        compiler_params=pltpu.CompilerParams(
            dimension_semantics=("parallel",),
            vmem_limit_bytes=vmem_limit),
        cost_estimate=pl.CostEstimate(
            flops=6 * N * F * F, transcendentals=0,
            bytes_accessed=4 * (5 * N * F + 3 * F * F + 3 * F)),
    )(x2, c2, wq_t, bq2, wkv_t, bkv2)

    # ---- tiny prepass: exact per-feature K extrema for the softmax max -
    kT_full = kvT[:F]                                        # (F, N)
    kext = jnp.stack([jnp.max(kT_full, axis=1),
                      jnp.min(kT_full, axis=1)], axis=0)     # (2, F)

    # ---- kernel 2: per-feature softmax attention ------------------------
    tq = _choose_query_tile(N, F)
    tk_block, strip = _choose_context_tiles(N, F, tq)
    n_strips = tk_block // strip
    n_q = N // tq
    n_kv = N // tk_block

    out = pl.pallas_call(
        functools.partial(feature_attention_kernel,
                          feat=F, strip=strip, n_strips=n_strips),
        out_shape=jax.ShapeDtypeStruct((N, F), x2.dtype),
        grid=(n_q, n_kv),
        in_specs=[
            pl.BlockSpec((tq, F), lambda i, kv: (i, 0)),           # Q tile
            pl.BlockSpec((2 * F, tk_block), lambda i, kv: (0, kv)),# K^T|V^T block
            pl.BlockSpec((2, F), lambda i, kv: (0, 0)),            # kmax/kmin
        ],
        out_specs=pl.BlockSpec((tq, F), lambda i, kv: (i, 0)),
        scratch_shapes=[pltpu.VMEM((tq, F), jnp.float32),          # denominator
                        pltpu.VMEM((tq, F), jnp.float32)],         # numerator
        compiler_params=pltpu.CompilerParams(
            dimension_semantics=("parallel", "arbitrary"),
            vmem_limit_bytes=vmem_limit),
        cost_estimate=pl.CostEstimate(
            flops=5 * N * N * F,
            transcendentals=N * N * F,
            bytes_accessed=4 * (2 * N * F + n_q * 2 * F * N + 2 * F)),
    )(q_s, kvT, kext)
    return out


@functools.partial(jax.jit, static_argnames=("n_head",))
def _cross_attention_jit(x, c, params, n_head):
    shape = x.shape
    if x.ndim == 3:
        x2 = x.reshape(-1, shape[-1])
        c2 = c.reshape(-1, c.shape[-1])
    else:
        x2, c2 = x, c
    out = _forward(x2, c2, params, n_head)
    if x.ndim == 3:
        out = out.reshape(shape)
    return out


def cross_attention(x, c, params, n_head):
    """Pallas implementation of CrossAttention.forward (jitted, single trace)."""
    return _cross_attention_jit(x, c, params, n_head)


# --------------------------------------------------------------------------
# Pure-JAX reference (mirrors the PyTorch forward exactly).
# --------------------------------------------------------------------------
def cross_attention_reference(x, c, params, n_head):
    shape = x.shape
    if x.ndim == 3:
        x = x.reshape(-1, x.shape[-1])
        c = c.reshape(-1, c.shape[-1])
    wq, bq, wk, bk, wv, bv = params
    N, F = x.shape
    df = F // n_head
    Q = x @ wq.T + bq
    K = c @ wk.T + bk
    V = c @ wv.T + bv
    Q = Q.reshape(N, n_head, df)[:, None, :, :]
    K = K.reshape(N, n_head, df)[None, :, :, :]
    V = V.reshape(N, n_head, df)[None, :, :, :]
    Y = Q * K / math.sqrt(df)
    attn = jax.nn.softmax(Y, axis=1)
    out = (attn * V).sum(axis=1).reshape(N, F)
    if len(shape) == 3:
        out = out.reshape(shape)
    return out


def init_params(key, xdim):
    """Deterministic nn.Linear-style init (uniform(-1/sqrt(in), 1/sqrt(in)))."""
    bound = 1.0 / math.sqrt(xdim)
    keys = jax.random.split(key, 6)
    wq = jax.random.uniform(keys[0], (xdim, xdim), jnp.float32, -bound, bound)
    bq = jax.random.uniform(keys[1], (xdim,), jnp.float32, -bound, bound)
    wk = jax.random.uniform(keys[2], (xdim, xdim), jnp.float32, -bound, bound)
    bk = jax.random.uniform(keys[3], (xdim,), jnp.float32, -bound, bound)
    wv = jax.random.uniform(keys[4], (xdim, xdim), jnp.float32, -bound, bound)
    bv = jax.random.uniform(keys[5], (xdim,), jnp.float32, -bound, bound)
    return (wq, bq, wk, bk, wv, bv)


if __name__ == "__main__":
    B, S, XDIM, N_HEAD = 2, 8, 32, 4   # df = 8, N = B*S = 16 tokens

    key = jax.random.PRNGKey(0)
    kx, kc, kp = jax.random.split(key, 3)
    x = jax.random.normal(kx, (B, S, XDIM), jnp.float32)
    c = jax.random.normal(kc, (B, S, XDIM), jnp.float32)
    params = init_params(kp, XDIM)

    out = jax.block_until_ready(cross_attention(x, c, params, N_HEAD))

    ref = cross_attention_reference(x, c, params, N_HEAD)
    assert out.shape == (B, S, XDIM)
    # Tolerance covers the EUP approximate-reciprocal epilogue.
    assert jnp.allclose(out, ref, atol=2e-3, rtol=2e-3), "mismatch vs reference"

    print("KERNEL_OK")
</pallas_src>

<mosaic_0001>
module attributes {stable_mosaic.version = 11 : i64} {
  func.func @qkv_project_kernel(%arg0: i32, %arg1: memref<16x32xf32, #tpu.memory_space<vmem>>, %arg2: memref<16x32xf32, #tpu.memory_space<vmem>>, %arg3: memref<32x32xf32, #tpu.memory_space<vmem>>, %arg4: memref<1x32xf32, #tpu.memory_space<vmem>>, %arg5: memref<32x64xf32, #tpu.memory_space<vmem>>, %arg6: memref<1x64xf32, #tpu.memory_space<vmem>>, %arg7: memref<16x32xf32, #tpu.memory_space<vmem>>, %arg8: memref<64x16xf32, #tpu.memory_space<vmem>>) attributes {dimension_semantics = [#tpu.dimension_semantics<parallel>], iteration_bounds = array<i64: 1>, scalar_prefetch = 0 : i64, scratch_operands = 0 : i64, tpu.core_type = #tpu.core_type<tc>, window_params = [{transform_indices = @transform_0, window_bounds = array<i64: 16, 32>}, {transform_indices = @transform_1, window_bounds = array<i64: 16, 32>}, {pipeline_mode = #tpu.pipeline_mode<synchronous>, transform_indices = @transform_2, window_bounds = array<i64: 32, 32>}, {pipeline_mode = #tpu.pipeline_mode<synchronous>, transform_indices = @transform_3, window_bounds = array<i64: 1, 32>}, {pipeline_mode = #tpu.pipeline_mode<synchronous>, transform_indices = @transform_4, window_bounds = array<i64: 32, 64>}, {pipeline_mode = #tpu.pipeline_mode<synchronous>, transform_indices = @transform_5, window_bounds = array<i64: 1, 64>}, {transform_indices = @transform_6, window_bounds = array<i64: 16, 32>}, {transform_indices = @transform_7, window_bounds = array<i64: 64, 16>}]} {
    %c0 = arith.constant 0 : index
    %c0_0 = arith.constant 0 : index
    %0 = vector.load %arg1[%c0, %c0_0] : memref<16x32xf32, #tpu.memory_space<vmem>>, vector<16x32xf32>
    %c0_1 = arith.constant 0 : index
    %c0_2 = arith.constant 0 : index
    %1 = vector.load %arg2[%c0_1, %c0_2] : memref<16x32xf32, #tpu.memory_space<vmem>>, vector<16x32xf32>
    %c0_3 = arith.constant 0 : index
    %c0_4 = arith.constant 0 : index
    %2 = vector.load %arg3[%c0_3, %c0_4] : memref<32x32xf32, #tpu.memory_space<vmem>>, vector<32x32xf32>
    %cst = arith.constant dense<0.000000e+00> : vector<16x32xf32>
    %3 = tpu.matmul %0, %2, %cst {dimension_numbers = #tpu.dot_dimension_numbers<[1], [0], [0], [1], [0, 0, 1, 1], [], []>} : vector<16x32xf32>, vector<32x32xf32>, vector<16x32xf32> -> vector<16x32xf32>
    %c0_5 = arith.constant 0 : index
    %c0_6 = arith.constant 0 : index
    %4 = vector.load %arg4[%c0_5, %c0_6] : memref<1x32xf32, #tpu.memory_space<vmem>>, vector<1x32xf32>
    %5 = vector.broadcast %4 : vector<1x32xf32> to vector<16x32xf32>
    %6 = arith.addf %3, %5 : vector<16x32xf32>
    %cst_7 = arith.constant 0.353553385 : f32
    %7 = vector.broadcast %cst_7 : f32 to vector<16x32xf32>
    %8 = arith.mulf %6, %7 : vector<16x32xf32>
    %c0_8 = arith.constant 0 : index
    %c0_9 = arith.constant 0 : index
    %9 = vector.load %arg7[%c0_8, %c0_9] : memref<16x32xf32, #tpu.memory_space<vmem>>, vector<16x32xf32>
    tpu.vector_store %arg7[%c0_8, %c0_9], %8 {strides = array<i32>} : memref<16x32xf32, #tpu.memory_space<vmem>>, vector<16x32xf32>,
    %c0_10 = arith.constant 0 : index
    %c0_11 = arith.constant 0 : index
    %10 = vector.load %arg5[%c0_10, %c0_11] : memref<32x64xf32, #tpu.memory_space<vmem>>, vector<32x64xf32>
    %cst_12 = arith.constant dense<0.000000e+00> : vector<16x64xf32>
    %11 = tpu.matmul %1, %10, %cst_12 {dimension_numbers = #tpu.dot_dimension_numbers<[1], [0], [0], [1], [0, 0, 1, 1], [], []>} : vector<16x32xf32>, vector<32x64xf32>, vector<16x64xf32> -> vector<16x64xf32>
    %c0_13 = arith.constant 0 : index
    %c0_14 = arith.constant 0 : index
    %12 = vector.load %arg6[%c0_13, %c0_14] : memref<1x64xf32, #tpu.memory_space<vmem>>, vector<1x64xf32>
    %13 = vector.broadcast %12 : vector<1x64xf32> to vector<16x64xf32>
    %14 = arith.addf %11, %13 : vector<16x64xf32>
    %15 = tpu.transpose %14, [1, 0] : vector<16x64xf32> -> vector<64x16xf32>
    %c0_15 = arith.constant 0 : index
    %c0_16 = arith.constant 0 : index
    %16 = vector.load %arg8[%c0_15, %c0_16] : memref<64x16xf32, #tpu.memory_space<vmem>>, vector<64x16xf32>
    tpu.vector_store %arg8[%c0_15, %c0_16], %15 {strides = array<i32>} : memref<64x16xf32, #tpu.memory_space<vmem>>, vector<64x16xf32>,
    return
  }
  func.func @transform_0(%arg0: i32) -> (i32, i32) {
    %c0_i32 = arith.constant 0 : i32
    %c0_i32_0 = arith.constant 0 : i32
    return %arg0, %c0_i32 : i32, i32
  }
  func.func @transform_1(%arg0: i32) -> (i32, i32) {
    %c0_i32 = arith.constant 0 : i32
    %c0_i32_0 = arith.constant 0 : i32
    return %arg0, %c0_i32 : i32, i32
  }
  func.func @transform_2(%arg0: i32) -> (i32, i32) {
    %c0_i32 = arith.constant 0 : i32
    %c0_i32_0 = arith.constant 0 : i32
    %c0_i32_1 = arith.constant 0 : i32
    return %c0_i32, %c0_i32_0 : i32, i32
  }
  func.func @transform_3(%arg0: i32) -> (i32, i32) {
    %c0_i32 = arith.constant 0 : i32
    %c0_i32_0 = arith.constant 0 : i32
    %c0_i32_1 = arith.constant 0 : i32
    return %c0_i32, %c0_i32_0 : i32, i32
  }
  func.func @transform_4(%arg0: i32) -> (i32, i32) {
    %c0_i32 = arith.constant 0 : i32
    %c0_i32_0 = arith.constant 0 : i32
    %c0_i32_1 = arith.constant 0 : i32
    return %c0_i32, %c0_i32_0 : i32, i32
  }
  func.func @transform_5(%arg0: i32) -> (i32, i32) {
    %c0_i32 = arith.constant 0 : i32
    %c0_i32_0 = arith.constant 0 : i32
    %c0_i32_1 = arith.constant 0 : i32
    return %c0_i32, %c0_i32_0 : i32, i32
  }
  func.func @transform_6(%arg0: i32) -> (i32, i32) {
    %c0_i32 = arith.constant 0 : i32
    %c0_i32_0 = arith.constant 0 : i32
    return %arg0, %c0_i32 : i32, i32
  }
  func.func @transform_7(%arg0: i32) -> (i32, i32) {
    %c0_i32 = arith.constant 0 : i32
    %c0_i32_0 = arith.constant 0 : i32
    return %c0_i32, %arg0 : i32, i32
  }
}

module attributes {stable_mosaic.version = 11 : i64} {
  func.func @feature_attention_kernel(%arg0: i32, %arg1: i32, %arg2: memref<8x32xf32, #tpu.memory_space<vmem>>, %arg3: memref<64x16xf32, #tpu.memory_space<vmem>>, %arg4: memref<2x32xf32, #tpu.memory_space<vmem>>, %arg5: memref<8x32xf32, #tpu.memory_space<vmem>>, %arg6: memref<8x32xf32, #tpu.memory_space<vmem>>, %arg7: memref<8x32xf32, #tpu.memory_space<vmem>>) attributes {dimension_semantics = [#tpu.dimension_semantics<parallel>, #tpu.dimension_semantics<arbitrary>], iteration_bounds = array<i64: 2, 1>, scalar_prefetch = 0 : i64, scratch_operands = 2 : i64, tpu.core_type = #tpu.core_type<tc>, window_params = [{transform_indices = @transform_0, window_bounds = array<i64: 8, 32>}, {transform_indices = @transform_1, window_bounds = array<i64: 64, 16>}, {pipeline_mode = #tpu.pipeline_mode<synchronous>, transform_indices = @transform_2, window_bounds = array<i64: 2, 32>}, {transform_indices = @transform_3, window_bounds = array<i64: 8, 32>}]} {
    %c0_i32 = arith.constant 0 : i32
    %0 = arith.cmpi eq, %arg1, %c0_i32 : i32
    %1 = arith.extui %0 : i1 to i32
    %c0_i32_0 = arith.constant 0 : i32
    %2 = arith.cmpi ne, %1, %c0_i32_0 : i32
    scf.if %2 {
      %cst_18 = arith.constant 0.000000e+00 : f32
      %37 = vector.broadcast %cst_18 : f32 to vector<8x32xf32>
      %c0_19 = arith.constant 0 : index
      %c0_20 = arith.constant 0 : index
      %38 = vector.load %arg6[%c0_19, %c0_20] : memref<8x32xf32, #tpu.memory_space<vmem>>, vector<8x32xf32>
      tpu.vector_store %arg6[%c0_19, %c0_20], %37 {strides = array<i32>} : memref<8x32xf32, #tpu.memory_space<vmem>>, vector<8x32xf32>,
      %cst_21 = arith.constant 0.000000e+00 : f32
      %39 = vector.broadcast %cst_21 : f32 to vector<8x32xf32>
      %c0_22 = arith.constant 0 : index
      %c0_23 = arith.constant 0 : index
      %40 = vector.load %arg7[%c0_22, %c0_23] : memref<8x32xf32, #tpu.memory_space<vmem>>, vector<8x32xf32>
      tpu.vector_store %arg7[%c0_22, %c0_23], %39 {strides = array<i32>} : memref<8x32xf32, #tpu.memory_space<vmem>>, vector<8x32xf32>,
    } else {
    }
    %c0 = arith.constant 0 : index
    %c0_1 = arith.constant 0 : index
    %3 = vector.load %arg2[%c0, %c0_1] : memref<8x32xf32, #tpu.memory_space<vmem>>, vector<8x32xf32>
    %c0_2 = arith.constant 0 : index
    %c0_3 = arith.constant 0 : index
    %4 = vector.load %arg4[%c0_2, %c0_3] : memref<2x32xf32, #tpu.memory_space<vmem>>, vector<2x32xf32>
    %5 = vector.extract_strided_slice %4 {offsets = [0, 0], sizes = [1, 32], strides = [1, 1]} : vector<2x32xf32> to vector<1x32xf32>
    %6 = vector.broadcast %5 : vector<1x32xf32> to vector<8x32xf32>
    %7 = arith.mulf %3, %6 : vector<8x32xf32>
    %8 = vector.extract_strided_slice %4 {offsets = [1, 0], sizes = [1, 32], strides = [1, 1]} : vector<2x32xf32> to vector<1x32xf32>
    %9 = vector.broadcast %8 : vector<1x32xf32> to vector<8x32xf32>
    %10 = arith.mulf %3, %9 : vector<8x32xf32>
    %11 = arith.maximumf %7, %10 : vector<8x32xf32>
    %12 = vector.shape_cast %3 : vector<8x32xf32> to vector<8x32x1xf32>
    %13 = vector.shape_cast %11 : vector<8x32xf32> to vector<8x32x1xf32>
    %c0_4 = arith.constant 0 : index
    %c0_5 = arith.constant 0 : index
    %14 = vector.load %arg6[%c0_4, %c0_5] : memref<8x32xf32, #tpu.memory_space<vmem>>, vector<8x32xf32>
    %c0_6 = arith.constant 0 : index
    %c0_7 = arith.constant 0 : index
    %15 = vector.load %arg7[%c0_6, %c0_7] : memref<8x32xf32, #tpu.memory_space<vmem>>, vector<8x32xf32>
    %c0_8 = arith.constant 0 : index
    %c0_9 = arith.constant 0 : index
    %16 = vector.load %arg3[%c0_8, %c0_9] : memref<64x16xf32, #tpu.memory_space<vmem>>, vector<32x16xf32>
    %c32 = arith.constant 32 : index
    %c0_10 = arith.constant 0 : index
    %17 = vector.load %arg3[%c32, %c0_10] : memref<64x16xf32, #tpu.memory_space<vmem>>, vector<32x16xf32>
    %18 = vector.shape_cast %16 : vector<32x16xf32> to vector<1x32x16xf32>
    %19 = vector.broadcast %12 : vector<8x32x1xf32> to vector<8x32x16xf32>
    %20 = vector.broadcast %18 : vector<1x32x16xf32> to vector<8x32x16xf32>
    %21 = arith.mulf %19, %20 : vector<8x32x16xf32>
    %22 = vector.broadcast %13 : vector<8x32x1xf32> to vector<8x32x16xf32>
    %23 = arith.subf %21, %22 : vector<8x32x16xf32>
    %24 = math.exp %23 : vector<8x32x16xf32>
    %cst = arith.constant dense<0.000000e+00> : vector<8x32xf32>
    %25 = vector.multi_reduction <add>, %24, %cst [2] : vector<8x32x16xf32> to vector<8x32xf32>
    %26 = arith.addf %14, %25 : vector<8x32xf32>
    %27 = vector.shape_cast %17 : vector<32x16xf32> to vector<1x32x16xf32>
    %28 = vector.broadcast %27 : vector<1x32x16xf32> to vector<8x32x16xf32>
    %29 = arith.mulf %24, %28 : vector<8x32x16xf32>
    %cst_11 = arith.constant dense<0.000000e+00> : vector<8x32xf32>
    %30 = vector.multi_reduction <add>, %29, %cst_11 [2] : vector<8x32x16xf32> to vector<8x32xf32>
    %31 = arith.addf %15, %30 : vector<8x32xf32>
    %c0_12 = arith.constant 0 : index
    %c0_13 = arith.constant 0 : index
    %32 = vector.load %arg6[%c0_12, %c0_13] : memref<8x32xf32, #tpu.memory_space<vmem>>, vector<8x32xf32>
    tpu.vector_store %arg6[%c0_12, %c0_13], %26 {strides = array<i32>} : memref<8x32xf32, #tpu.memory_space<vmem>>, vector<8x32xf32>,
    %c0_14 = arith.constant 0 : index
    %c0_15 = arith.constant 0 : index
    %33 = vector.load %arg7[%c0_14, %c0_15] : memref<8x32xf32, #tpu.memory_space<vmem>>, vector<8x32xf32>
    tpu.vector_store %arg7[%c0_14, %c0_15], %31 {strides = array<i32>} : memref<8x32xf32, #tpu.memory_space<vmem>>, vector<8x32xf32>,
    %c0_i32_16 = arith.constant 0 : i32
    %34 = arith.cmpi eq, %arg1, %c0_i32_16 : i32
    %35 = arith.extui %34 : i1 to i32
    %c0_i32_17 = arith.constant 0 : i32
    %36 = arith.cmpi ne, %35, %c0_i32_17 : i32
    scf.if %36 {
      %c0_18 = arith.constant 0 : index
      %c0_19 = arith.constant 0 : index
      %37 = vector.load %arg6[%c0_18, %c0_19] : memref<8x32xf32, #tpu.memory_space<vmem>>, vector<8x32xf32>
      %38 = tpu.reciprocal %37 {approx = true} : vector<8x32xf32> -> vector<8x32xf32>
      %c0_20 = arith.constant 0 : index
      %c0_21 = arith.constant 0 : index
      %39 = vector.load %arg7[%c0_20, %c0_21] : memref<8x32xf32, #tpu.memory_space<vmem>>, vector<8x32xf32>
      %40 = arith.mulf %39, %38 : vector<8x32xf32>
      %c0_22 = arith.constant 0 : index
      %c0_23 = arith.constant 0 : index
      %41 = vector.load %arg5[%c0_22, %c0_23] : memref<8x32xf32, #tpu.memory_space<vmem>>, vector<8x32xf32>
      tpu.vector_store %arg5[%c0_22, %c0_23], %40 {strides = array<i32>} : memref<8x32xf32, #tpu.memory_space<vmem>>, vector<8x32xf32>,
    } else {
    }
    return
  }
  func.func @transform_0(%arg0: i32, %arg1: i32) -> (i32, i32) {
    %c0_i32 = arith.constant 0 : i32
    %c0_i32_0 = arith.constant 0 : i32
    return %arg0, %c0_i32 : i32, i32
  }
  func.func @transform_1(%arg0: i32, %arg1: i32) -> (i32, i32) {
    %c0_i32 = arith.constant 0 : i32
    %c0_i32_0 = arith.constant 0 : i32
    return %c0_i32, %arg1 : i32, i32
  }
  func.func @transform_2(%arg0: i32, %arg1: i32) -> (i32, i32) {
    %c0_i32 = arith.constant 0 : i32
    %c0_i32_0 = arith.constant 0 : i32
    %c0_i32_1 = arith.constant 0 : i32
    return %c0_i32, %c0_i32_0 : i32, i32
  }
  func.func @transform_3(%arg0: i32, %arg1: i32) -> (i32, i32) {
    %c0_i32 = arith.constant 0 : i32
    %c0_i32_0 = arith.constant 0 : i32
    return %arg0, %c0_i32 : i32, i32
  }
}

</mosaic_0001>

<bundles_post_ra>
// kernel: _cross_attention_jit.2
= control target key start
LH: loop header
LB: loop body
LE: loop exit
PB: predicated region body
PF: predicated region fallthrough
CT: control target
= control target key end

     0   :  { %vm37_vm0 = vcmask 261120   ;;  %vm140_vm1 = vcmask 130048   ;;  %s298_s4 = inlined_call_operand.vmem [shape: f32[32,64], index: 4, kind: input, shape index: {}]   ;;  %s299_s1 = inlined_call_operand.vmem [shape: f32[16,32], index: 1, kind: input, shape index: {}]   ;;  %s300_s5 = inlined_call_operand.vmem [shape: f32[1,64], index: 5, kind: input, shape index: {}]   ;;  %s301_s2 = inlined_call_operand.vmem [shape: f32[32,32], index: 2, kind: input, shape index: {}]   ;;  %s302_s0 = inlined_call_operand.vmem [shape: f32[16,32], index: 0, kind: input, shape index: {}]   ;;  %s303_s3 = inlined_call_operand.vmem [shape: f32[1,32], index: 3, kind: input, shape index: {}]   ;;  %s304_s7 = inlined_call_operand.vmem [shape: f32[64,16], index: 7, kind: output, shape index: {1}]   ;;  %s305_s6 = inlined_call_operand.vmem [shape: f32[16,32], index: 6, kind: output, shape index: {0}]  }
   0x1   :  { %v74_v0 = vld [vmem:[%s298_s4 + $0x18] sm:$0xff]  ;;  %v73_v1 = vld [vmem:[%s298_s4 + $0x10] sm:$0xff]  ;;  %v72_v2 = vld [vmem:[%s298_s4 + $0x8] sm:$0xff] }
   0x2   :  { %97 = vmatpush.msra.mxu1 %v74_v0  ;;  %165 = vmatpush.msra.mxu3 %v74_v0  ;;  %v71_v3 = vld [vmem:[%s298_s4] sm:$0xff]  ;;  %v28_v5 = vld [vmem:[%s299_s1 + $0x8] sm:$0xff]  ;;  %v32_v6 = vld [vmem:[%s301_s2 + $0x18] sm:$0xff] }
   0x3   :  { %v27_v4 = vld [vmem:[%s299_s1] sm:$0xff]  ;;  %v31_v7 = vld [vmem:[%s301_s2 + $0x10] sm:$0xff]  ;;  %161 = vmatpush.msra.mxu2 %v32_v6  ;;  %56 = vmatpush.msra.mxu0 %v32_v6  ;;  %v30_v8 = vld [vmem:[%s301_s2 + $0x8] sm:$0xff] }
   0x4   :  { %98 = vmatpush.msra.mxu1 %v73_v1  ;;  %166 = vmatpush.msra.mxu3 %v73_v1  ;;  %v29_v9 = vld [vmem:[%s301_s2] sm:$0xff]  ;;  %v26_v10 = vld [vmem:[%s302_s0 + $0x8] sm:$0xff] }
   0x5   :  { %162 = vmatpush.msra.mxu2 %v31_v7  ;;  %57 = vmatpush.msra.mxu0 %v31_v7  ;;  %v25_v11 = vld [vmem:[%s302_s0] sm:$0xff] }
   0x6   :  { %99 = vmatpush.msra.mxu1 %v72_v2  ;;  %167 = vmatpush.msra.mxu3 %v72_v2  ;;  %v170_v12 = vld [vmem:[%s300_s5] ss:$0 sm:$0xff] }
   0x7   :  { %163 = vmatpush.msra.mxu2 %v30_v8  ;;  %58 = vmatpush.msra.mxu0 %v30_v8  ;;  %v171_v20 = vld [vmem:[%s303_s3] ss:$0 sm:$0xff] }
   0x8   :  { %100 = vmatpush.msra.mxu1 %v71_v3  ;;  %168 = vmatpush.msra.mxu3 %v71_v3 }
   0x9   :  { %159 = vmatmul.msk.f32.vlgmr.msra.gmra.mxu1 %vm37_vm0, %v27_v4  ;;  %160 = vmatmul.msk.f32.vlgmr.msra.gmra.mxu3 %vm37_vm0, %v28_v5 }
   0xa   :  { %164 = vmatpush.msra.mxu2 %v29_v9  ;;  %59 = vmatpush.msra.mxu0 %v29_v9 }
   0xb   :  { %158 = vmatmul.msk.f32.vlgmr.msra.gmra.mxu2 %vm37_vm0, %v26_v10  ;;  %157 = vmatmul.msk.f32.vlgmr.msra.gmra.mxu0 %vm37_vm0, %v25_v11 }
  0x86   :  { %v102_v13 = vpop.f32.mrf.mxu1 }
  0x87   :  { %v103_v14 = vadd.f32 %v170_v12, %v102_v13 }
  0x88   :  { %v61_v21 = vpop.f32.mrf.mxu0 }
  0x89   :  { %108 = vxpose.xlu0.b32.start [1/2] (short) (narrow) %v103_v14, 64  ;;  %v62_v23 = vadd.f32 %v171_v20, %v61_v21 }
  0x8b   :  { %v67_v25 = vmul.f32 0.35355338, %v62_v23 }
  0x8c   :  { %v105_v15 = vpop.f32.mrf.mxu3 }
  0x8d   :  { %v106_v16 = vadd.f32 %v170_v12, %v105_v15  ;;  %69 = vst.msk [vmem:[%s305_s6] sm:$0xff] %vm37_vm0, %v67_v25 }
  0x8e   :  { %v64_v22 = vpop.f32.mrf.mxu2 }
  0x8f   :  { %v65_v24 = vadd.f32 %v171_v20, %v64_v22 }
  0x91   :  { %109 = vxpose.xlu0.b32.end [2/2] (short) (narrow) %v106_v16, 64  ;;  %v68_v26 = vmul.f32 0.35355338, %v65_v24 }
  0x93   :  { %70 = vst.msk [vmem:[%s305_s6 + $0x8] sm:$0xff] %vm37_vm0, %v68_v26 }
 0x12d   :  { %v124_v17 = vpop.trf.xlu0 }
 0x12e   :  { %141 = vst.msk [vmem:[%s304_s7] sm:$0xff] %vm140_vm1, %v124_v17 }
 0x135   :  { %v125_v18 = vpop.trf.xlu0 }
 0x136   :  { %142 = vst.msk [vmem:[%s304_s7 + $0x8] sm:$0xff] %vm140_vm1, %v125_v18 }
 0x13d   :  { %v126_v19 = vpop.trf.xlu0 }
 0x13e   :  { %143 = vst.msk [vmem:[%s304_s7 + $0x10] sm:$0xff] %vm140_vm1, %v126_v19 }
 0x145   :  { %v127_v27 = vpop.trf.xlu0 }
 0x146   :  { %144 = vst.msk [vmem:[%s304_s7 + $0x18] sm:$0xff] %vm140_vm1, %v127_v27 }
 0x14d   :  { %v128_v28 = vpop.trf.xlu0 }
 0x14e   :  { %145 = vst.msk [vmem:[%s304_s7 + $0x20] sm:$0xff] %vm140_vm1, %v128_v28 }
 0x155   :  { %v129_v29 = vpop.trf.xlu0 }
 0x156   :  { %146 = vst.msk [vmem:[%s304_s7 + $0x28] sm:$0xff] %vm140_vm1, %v129_v29 }
 0x15d   :  { %v130_v30 = vpop.trf.xlu0 }
 0x15e   :  { %147 = vst.msk [vmem:[%s304_s7 + $0x30] sm:$0xff] %vm140_vm1, %v130_v30 }
 0x165   :  { %v131_v31 = vpop.trf.xlu0 }
 0x166   :  { %148 = vst.msk [vmem:[%s304_s7 + $0x38] sm:$0xff] %vm140_vm1, %v131_v31 }

// kernel: _cross_attention_jit.3
= control target key start
LH: loop header
LB: loop body
LE: loop exit
PB: predicated region body
PF: predicated region fallthrough
CT: control target
= control target key end

     0   :  { %8 = vsyncpa [#allocation5], 0  ;;  %s2443_s0 = inlined_call_operand.vmem [shape: f32[16,32], index: 0, kind: input, shape index: {}]   ;;  %s2444_s1 = inlined_call_operand.vmem [shape: f32[64,16], index: 1, kind: input, shape index: {}]   ;;  %s2445_s2 = inlined_call_operand.vmem [shape: f32[2,32], index: 2, kind: input, shape index: {}]   ;;  %s2446_s3 = inlined_call_operand.hbm [shape: f32[16,32], index: 3, kind: output, shape index: {}]  }
   0x1   :  { %10 = vsyncpa [#allocation5 + $0x1], 0  ;;  %s1579_s12 = smov 0   ;;  %s1581_s13 = smov 0  }
   0x2   :  { %s1583_s14 = smov 0   ;;  %s1585_s15 = smov 0  }
   0x3   :  { %s1587_s16 = smov 0   ;;  %s1589_s17 = smov 0  }
   0x4 LB: > { %s1290_s18 = sadd.s32 4294967295, %s1556_s17   ;;  %s1291_s19 = sadd.s32 4294967294, %s1556_s17   ;;  %s1556_s17 = sphi %s1589_s17, %s16_s17   ;;  %s1552_s16 = sphi %s1587_s16, %s2461_s16   ;;  %s1548_s15 = sphi %s1585_s15, %s2460_s15   ;;  %s1544_s14 = sphi %s1583_s14, %s2459_s14   ;;  %s1540_s13 = sphi %s1581_s13, %s2458_s13   ;;  %s1536_s12 = sphi %s1579_s12, %s2457_s12  }
   0x5   : > { %s28_s20 = sadd.s32 1, %s1552_s16  ;;  %s108_s21 = sadd.s32 1, %s1544_s14 }
   0x6   : > { %p30_p0 = scmp.ge.s32.totalorder %s28_s20, 2  ;;  %p118_p1 = scmp.ne.s32.totalorder %s1544_s14, %s1540_s13 }
   0x7   : > { %p119_p2 = scmp.eq.s32.totalorder %s1290_s18, 1  ;;  %p124_p3 = scmp.ne.s32.totalorder %s1540_s13, %s1536_s12 }
   0x8   : > { %s2463_s20 = smov (%p30_p0, %s28_s20), 0  ;;  %p125_p5 = scmp.eq.s32.totalorder %s1291_s19, 1 }
   0x9   : > { %p1619_p4 = por %p119_p2, %p118_p1  ;;  %s105_s23 = ssub.s32 %s1552_s16, %s2463_s20 }
   0xa   : > { %p1295_p6 = scmp.ge.s32.totalorder %s1556_s17, 1  ;;  %p106_p7 = scmp.eq.s32.totalorder %s105_s23, 0 }
   0xb   : > { %p1626_p8 = por %p125_p5, %p124_p3  ;;  %p160_p9 = scmp.lt.s32.totalorder %s1556_s17, 3 }
   0xc   : > { %s1632_s25 = scalar_select %p106_p7, %s1544_s14, %s108_s21  }
   0xd   : > { %p161_p10 = pnand %p1295_p6, %p160_p9 }
   0xe   : > { %p187_p11 = scmp.lt.s32.totalorder (!%p161_p10), %s1548_s15, 1  ;;  %s184_s5 = sand.u32 (!%p161_p10), 1, %s1540_s13  }
   0xf   : > { %164 = sbr.rel (%p161_p10) target bundleno = 769 (0x301), region = 32  ;;  %s1296_s6 = sshll.u32 (!%p161_p10), %s184_s5, 3 }
  0x10   : > { %s1299_s7 = sshll.u32 (!%p161_p10), %s1548_s15, 3  ;;  %s186_s11 = scalar_lea.vmem (!%p161_p10), [#allocation4], %s1296_s6 }
  0x11   : > { %s1203_s10 = scalar_lea.hbm (!%p161_p10), %s2446_s3, %s1299_s7  ;;  %s1205_s18 = sshll.u32 (!%p161_p10), %s186_s11, 4  ;;  %s1206_s18 = int_to_ptr.vmem [resolvable:$true] %s1205_s18 }
  0x12   : > { %s1207_s19 = sshll.u32 (!%p161_p10), %s1203_s10, 4  ;;  %s1193_s21 = scalar_lea.sflag (!%p161_p10), [#allocation5], %s184_s5  ;;  %s1208_s19 = int_to_ptr.hbm [resolvable:$true] %s1207_s19 }
  0x13   : > { %s1498_s28 = scalar_lea.hbm (!%p161_p10), %s2446_s3, 16 }
  0x14   : > { %v2447_v0 = vlaneseq  ;;  %s188_s26 = scalar_select %p187_p11, %s1548_s15, 1  ;;  %v203_v8 = vld [vmem:[%s2445_s2] sm:$0x3]  ;;  %v1740_v34 = vld [vmem:[%s2444_s1 + $0x8] sm:$0xff]  ;;  %v1774_v46 = vld [vmem:[%s2444_s1 + $0x10] sm:$0xff]  ;;  %vm747_vm0 = vcmask 130048  }
  0x15   : > { %v204_v10 = vperm.slane %v203_v8, 0  ;;  %v206_v11 = vperm.slane %v203_v8, 1  ;;  %v1796_v53 = vld [vmem:[%s2444_s1] sm:$0xff]  ;;  %vm881_vm1 = vcmask 130112   ;;  %vm885_vm2 = vcmask 195712   ;;  %s1492_s15 = sshra.s32 %s1208_s19, 4  ;;  %s1493_s15 = int_to_ptr.hbm [resolvable:$true] %s1492_s15 }
  0x16   : > { %v1636_v1 = vshrl.u32 %v2447_v0, 7  ;;  %s1297_s27 = sshll.u32 %s188_s26, 3  ;;  %vm889_vm3 = vcmask 261312   ;;  %vm940_vm4 = vcmask 1041409   ;;  %vm199_vm5 = vcmask 261120   ;;  %s1494_s23 = scalar_lea.hbm %s1493_s15, 8 }
  0x17   : > { %s190_s30 = scalar_lea.vmem %s2443_s0, %s1297_s27  ;;  %vm942_vm6 = vcmask 1042434   ;;  %vm944_vm7 = vcmask 1043459   ;;  %vm946_vm8 = vcmask 1044484   ;;  %vm948_vm9 = vcmask 1045509   ;;  %p1495_p12 = scmp.ne.s32.totalorder %s1493_s15, %s1494_s23 }
  0x18   : > { %1359 = vset.pattern.permute.xlu2 %v1636_v1  ;;  %1358 = vset.pattern.permute.xlu0 %v1636_v1  ;;  %v1642_v2 = vadd.s32 16, %v1636_v1  ;;  %v1648_v3 = vld [vmem:[%s190_s30] sm:$0xff]  ;;  %v1653_v6 = vadd.s32 8, %v1636_v1  ;;  %v1660_v9 = vadd.s32 24, %v1636_v1  ;;  %vm950_vm10 = vcmask 1046534   ;;  %p1499_p1 = scmp.lt.s32.totalorder %s1493_s15, %s2446_s3  ;;  %p1500_p2 = scmp.lt.s32.totalorder %s1498_s28, %s1494_s23 }
  0x19   : > { %v234_v4 = vperm.slane %v1648_v3, 1  ;;  %v209_v5 = vperm.slane %v1648_v3, 0  ;;  %v259_v7 = vperm.slane %v1648_v3, 2  ;;  %v1665_v12 = vperm.slane %v1648_v3, 7  ;;  %p1496_p13 = pnand %p1495_p12, %p1619_p4 }
  0x1a   : > { %1360 = vset.pattern.permute.xlu1 %v1642_v2  ;;  %v205_v13 = vmul.f32 %v204_v10, %v1648_v3  ;;  %v207_v14 = vmul.f32 %v206_v11, %v1648_v3  ;;  %v284_v17 = vperm.slane %v1648_v3, 3  ;;  %v309_v20 = vperm.slane %v1648_v3, 4  ;;  %p1501_p3 = por %p1500_p2, %p1499_p1 }
  0x1b   : > { %v334_v23 = vperm.slane %v1648_v3, 5  ;;  %v359_v28 = vperm.slane %v1648_v3, 6  ;;  %vm952_vm11 = vcmask 1047559   ;;  %p1497_p0 = pneg %p1496_p13 }
  0x1c   : > { %v1670_v15 = vmax.f32 %v205_v13, %v207_v14 }
  0x1d   : > { %p1502_p5 = pnand %p1501_p3, %p1497_p0 }
  0x1e   : > { %v1673_v16 = vperm.slane %v1670_v15, 4  ;;  %v1683_v18 = vperm.slane %v1670_v15, 0  ;;  %v1689_v19 = vperm.slane %v1670_v15, 5  ;;  %v1697_v21 = vperm.slane %v1670_v15, 1 }
  0x1f   : > { %v1703_v22 = vperm.slane %v1670_v15, 6  ;;  %v1713_v25 = vperm.slane %v1670_v15, 2  ;;  %v1732_v32 = vperm.slane %v1670_v15, 7  ;;  %v484_v10 = vperm.slane %v1670_v15, 3 }
  0x20   : > { %239 = vperm.xlu2 %1359, %v234_v4   ;;  %214 = vperm.xlu0 %1358, %v209_v5  }
  0x22   : > { %226 = vperm.xlu1 %1360, %v209_v5  }
  0x28   : > { %1362 = vset.pattern.permute.xlu2 %v1653_v6  ;;  %264 = vperm.xlu0 %1358, %v259_v7  }
  0x2a   : > { %1361 = vset.pattern.permute.xlu1 %v1660_v9 }
  0x30   : > { %245 = vperm.xlu2 %1362, %v234_v4   ;;  %389 = vperm.xlu0 %1358, %v1665_v12  }
  0x32   : > { %232 = vperm.xlu1 %1361, %v209_v5  }
  0x38   : > { %1364 = vset.pattern.permute.xlu2 %v1660_v9  ;;  %514 = vperm.xlu0 %1358, %v1673_v16  }
  0x3a   : > { %1363 = vset.pattern.permute.xlu1 %v1642_v2 }
  0x40   : > { %257 = vperm.xlu2 %1364, %v234_v4   ;;  %1397 = vset.pattern.permute.xlu0 %v1653_v6 }
  0x42   : > { %251 = vperm.xlu1 %1363, %v234_v4  }
  0x48   : > { %1366 = vset.pattern.permute.xlu2 %v1642_v2  ;;  %220 = vperm.xlu0 %1397, %v209_v5  }
  0x4a   : > { %1365 = vset.pattern.permute.xlu1 %v1653_v6 }
  0x50   : > { %276 = vperm.xlu2 %1366, %v259_v7   ;;  %295 = vperm.xlu0 %1397, %v284_v17  }
  0x52   : > { %270 = vperm.xlu1 %1365, %v259_v7  }
  0x58   : > { %1368 = vset.pattern.permute.xlu2 %v1636_v1  ;;  %420 = vperm.xlu0 %1397, %v1683_v18  }
  0x5a   : > { %1367 = vset.pattern.permute.xlu1 %v1660_v9 }
  0x60   : > { %289 = vperm.xlu2 %1368, %v284_v17   ;;  %545 = vperm.xlu0 %1397, %v1689_v19  }
  0x62   : > { %282 = vperm.xlu1 %1367, %v259_v7  }
  0x68   : > { %1370 = vset.pattern.permute.xlu2 %v1660_v9  ;;  %1402 = vset.pattern.permute.xlu0 %v1642_v2 }
  0x6a   : > { %1369 = vset.pattern.permute.xlu1 %v1642_v2 }
  0x70   : > { %307 = vperm.xlu2 %1370, %v284_v17   ;;  %326 = vperm.xlu0 %1402, %v309_v20  }
  0x72   : > { %301 = vperm.xlu1 %1369, %v284_v17  }
  0x78   : > { %1372 = vset.pattern.permute.xlu2 %v1653_v6  ;;  %451 = vperm.xlu0 %1402, %v1697_v21  }
  0x7a   : > { %1371 = vset.pattern.permute.xlu1 %v1636_v1  ;;  %v1758_v41 = vpop.permute.xlu2 %239 }
  0x80   : > { %320 = vperm.xlu2 %1372, %v309_v20   ;;  %576 = vperm.xlu0 %1402, %v1703_v22  }
  0x82   : > { %314 = vperm.xlu1 %1371, %v309_v20  }
  0x88   : > { %1374 = vset.pattern.permute.xlu2 %v1636_v1  ;;  %1407 = vset.pattern.permute.xlu0 %v1660_v9 }
  0x8a   : > { %1373 = vset.pattern.permute.xlu1 %v1660_v9  ;;  %v1764_v43 = vpop.permute.xlu2 %245 }
  0x90   : > { %339 = vperm.xlu2 %1374, %v334_v23   ;;  %357 = vperm.xlu0 %1407, %v334_v23  }
  0x92   : > { %332 = vperm.xlu1 %1373, %v309_v20   ;;  %v1710_v24 = vpop.permute.xlu0 %214 }
  0x93   : > { %v1850_v17 = vmul.f32 %v1796_v53, %v1710_v24 }
  0x94   : > { %v1734_v33 = vpop.permute.xlu1 %226 }
  0x98   : > { %1376 = vset.pattern.permute.xlu2 %v1642_v2  ;;  %482 = vperm.xlu0 %1407, %v1713_v25  }
  0x9a   : > { %1375 = vset.pattern.permute.xlu1 %v1653_v6  ;;  %v1718_v26 = vpop.permute.xlu0 %264  ;;  %v1780_v48 = vpop.permute.xlu2 %257 }
  0x9b   : > { %v627_v0 = vmul.f32 %v1796_v53, %v1718_v26 }
  0xa0   : > { %351 = vperm.xlu2 %1376, %v334_v23   ;;  %607 = vperm.xlu0 %1407, %v1732_v32  }
  0xa2   : > { %345 = vperm.xlu1 %1375, %v334_v23   ;;  %v1720_v27 = vpop.permute.xlu0 %389 }
  0xa4   : > { %v1751_v38 = vpop.permute.xlu1 %232 }
  0xa8   : > { %1378 = vset.pattern.permute.xlu2 %v1653_v6 }
  0xaa   : > { %1377 = vset.pattern.permute.xlu1 %v1636_v1  ;;  %v1725_v29 = vpop.permute.xlu0 %514  ;;  %v1790_v52 = vpop.permute.xlu2 %276 }
  0xb0   : > { %370 = vperm.xlu2 %1378, %v359_v28  }
  0xb2   : > { %364 = vperm.xlu1 %1377, %v359_v28  }
  0xb4   : > { %v252_v39 = vpop.permute.xlu1 %251 }
  0xb5   : > { %v1778_v47 = vmul.f32 %v1774_v46, %v252_v39 }
  0xb8   : > { %1380 = vset.pattern.permute.xlu2 %v1660_v9 }
  0xba   : > { %1379 = vset.pattern.permute.xlu1 %v1642_v2  ;;  %v221_v30 = vpop.permute.xlu0 %220  ;;  %v1804_v57 = vpop.permute.xlu2 %289 }
  0xbb   : > { %v1743_v35 = vmul.f32 %v1740_v34, %v221_v30  ;;  %v1882_v30 = vmul.f32 %v1740_v34, %v1764_v43 }
  0xc0   : > { %382 = vperm.xlu2 %1380, %v359_v28  }
  0xc2   : > { %376 = vperm.xlu1 %1379, %v359_v28   ;;  %v1729_v31 = vpop.permute.xlu0 %295 }
  0xc4   : > { %v1761_v42 = vpop.permute.xlu1 %270 }
  0xc8   : > { %1382 = vset.pattern.permute.xlu2 %v1642_v2 }
  0xca   : > { %1381 = vset.pattern.permute.xlu1 %v1653_v6  ;;  %v1747_v36 = vpop.permute.xlu0 %420  ;;  %v1808_v58 = vpop.permute.xlu2 %307 }
  0xcb   : > { %v652_v37 = vsub.f32 %v1743_v35, %v1747_v36 }
  0xd0   : > { %401 = vperm.xlu2 %1382, %v1665_v12  }
  0xd2   : > { %395 = vperm.xlu1 %1381, %v1665_v12   ;;  %v1756_v40 = vpop.permute.xlu0 %545 }
  0xd4   : > { %v1769_v45 = vpop.permute.xlu1 %282 }
  0xd8   : > { %1384 = vset.pattern.permute.xlu2 %v1636_v1 }
  0xda   : > { %1383 = vset.pattern.permute.xlu1 %v1660_v9  ;;  %v1812_v59 = vpop.permute.xlu2 %320 }
  0xdb   : > { %v636_v35 = vmul.f32 %v1740_v34, %v1812_v59 }
  0xe0   : > { %414 = vperm.xlu2 %1384, %v1683_v18  }
  0xe2   : > { %407 = vperm.xlu1 %1383, %v1665_v12   ;;  %v1767_v44 = vpop.permute.xlu0 %326 }
  0xe4   : > { %v1787_v51 = vpop.permute.xlu1 %301 }
  0xe8   : > { %1386 = vset.pattern.permute.xlu2 %v1660_v9 }
  0xea   : > { %1385 = vset.pattern.permute.xlu1 %v1642_v2  ;;  %v1783_v49 = vpop.permute.xlu0 %451  ;;  %v1818_v61 = vpop.permute.xlu2 %339 }
  0xf0   : > { %432 = vperm.xlu2 %1386, %v1683_v18  }
  0xf2   : > { %426 = vperm.xlu1 %1385, %v1683_v18   ;;  %v1846_v14 = vpop.permute.xlu0 %576 }
  0xf4   : > { %v315_v54 = vpop.permute.xlu1 %314 }
  0xf5   : > { %v1799_v55 = vmul.f32 %v1796_v53, %v315_v54 }
  0xf8   : > { %1388 = vset.pattern.permute.xlu2 %v1653_v6 }
  0xfa   : > { %1387 = vset.pattern.permute.xlu1 %v1636_v1  ;;  %v1827_v4 = vpop.permute.xlu2 %351 }
 0x100   : > { %445 = vperm.xlu2 %1388, %v1697_v21  }
 0x102   : > { %439 = vperm.xlu1 %1387, %v1697_v21  }
 0x104   : > { %v1815_v60 = vpop.permute.xlu1 %332 }
 0x108   : > { %1390 = vset.pattern.permute.xlu2 %v1636_v1 }
 0x10a   : > { %1389 = vset.pattern.permute.xlu1 %v1660_v9  ;;  %v1831_v5 = vpop.permute.xlu2 %370 }
 0x110   : > { %464 = vperm.xlu2 %1390, %v1713_v25  }
 0x112   : > { %457 = vperm.xlu1 %1389, %v1697_v21   ;;  %v1863_v21 = vld [vmem:[%s2444_s1 + $0x18] sm:$0xff] }
 0x113   : > { %v1868_v23 = vmul.f32 %v1863_v21, %v1751_v38 }
 0x114   : > { %v346_v62 = vpop.permute.xlu1 %345 }
 0x115   : > { %v1822_v63 = vmul.f32 %v1740_v34, %v346_v62  ;;  %v1892_v62 = vpop.permute.xlu0 %357 }
 0x118   : > { %1392 = vset.pattern.permute.xlu2 %v1642_v2 }
 0x11a   : > { %1391 = vset.pattern.permute.xlu1 %v1653_v6  ;;  %v1835_v7 = vpop.permute.xlu2 %382 }
 0x11d   : > { %v483_v50 = vpop.permute.xlu0 %482 }
 0x120   : > { %476 = vperm.xlu2 %1392, %v1713_v25  }
 0x122   : > { %470 = vperm.xlu1 %1391, %v1713_v25  }
 0x124   : > { %v1838_v8 = vpop.permute.xlu1 %364 }
 0x128   : > { %1394 = vset.pattern.permute.xlu2 %v1653_v6 }
 0x12a   : > { %1393 = vset.pattern.permute.xlu1 %v1636_v1  ;;  %v1841_v11 = vpop.permute.xlu2 %401 }
 0x130   : > { %495 = vperm.xlu2 %1394, %v484_v10  }
 0x132   : > { %489 = vperm.xlu1 %1393, %v484_v10  }
 0x134   : > { %v377_v12 = vpop.permute.xlu1 %376 }
 0x135   : > { %v1844_v13 = vmul.f32 %v1774_v46, %v377_v12 }
 0x138   : > { %1396 = vset.pattern.permute.xlu2 %v1660_v9 }
 0x13a   : > { %1395 = vset.pattern.permute.xlu1 %v1642_v2  ;;  %v1856_v15 = vpop.permute.xlu2 %414 }
 0x13b   : > { %v651_v20 = vsub.f32 %v1850_v17, %v1856_v15 }
 0x140   : > { %507 = vperm.xlu2 %1396, %v484_v10  }
 0x142   : > { %501 = vperm.xlu1 %1395, %v484_v10   ;;  %v621_v10 = vmul.f32 %v1774_v46, %v1734_v33 }
 0x144   : > { %v1877_v28 = vpop.permute.xlu1 %395 }
 0x148   : > { %1399 = vset.pattern.permute.xlu2 %v1642_v2 }
 0x14a   : > { %1398 = vset.pattern.permute.xlu1 %v1653_v6  ;;  %v1871_v24 = vpop.permute.xlu2 %432 }
 0x14b   : > { %v2450_v36 = vsub.f32 %v1868_v23, %v1871_v24 }
 0x150   : > { %526 = vperm.xlu2 %1399, %v1673_v16  }
 0x152   : > { %520 = vperm.xlu1 %1398, %v1673_v16  }
 0x154   : > { %v1889_v54 = vpop.permute.xlu1 %407 }
 0x158   : > { %1401 = vset.pattern.permute.xlu2 %v1636_v1 }
 0x15a   : > { %1400 = vset.pattern.permute.xlu1 %v1660_v9  ;;  %v1885_v38 = vpop.permute.xlu2 %445 }
 0x15b   : > { %v2451_v23 = vsub.f32 %v1882_v30, %v1885_v38 }
 0x15d   : > { %v693_v24 = vmul.f32 1.442695, %v2451_v23 }
 0x160   : > { %539 = vperm.xlu2 %1401, %v1689_v19  }
 0x162   : > { %532 = vperm.xlu1 %1400, %v1673_v16   ;;  %v630_v16 = vmul.f32 %v1863_v21, %v1769_v45 }
 0x164   : > { %v427_v43 = vpop.permute.xlu1 %426  ;;  %v662_v33 = vsub.f32 %v630_v16, %v483_v50 }
 0x165   : > { %v653_v12 = vsub.f32 %v621_v10, %v427_v43 }
 0x167   : > { %v687_v3 = vmul.f32 1.442695, %v653_v12 }
 0x168   : > { %1404 = vset.pattern.permute.xlu2 %v1660_v9 }
 0x169   : > { %1412 = vpow2.f32 %v687_v3  ;;  %v705_v3 = vmul.f32 1.442695, %v662_v33  ;;  %v683_v33 = vmul.f32 1.442695, %v651_v20 }
 0x16a   : > { %1403 = vset.pattern.permute.xlu1 %v1642_v2  ;;  %v465_v56 = vpop.permute.xlu2 %464 }
 0x16b   : > { %v659_v18 = vsub.f32 %v627_v0, %v465_v56 }
 0x16d   : > { %v699_v39 = vmul.f32 1.442695, %v659_v18 }
 0x16f   : > { %v1903_v25 = vpop.eup %1412  ;;  %1414 = vpow2.f32 %v699_v39 }
 0x170   : > { %557 = vperm.xlu2 %1404, %v1689_v19   ;;  %v754_v26 = vsel %vm747_vm0, %v1903_v25, 0.0  ;;  %1416 = vpow2.f32 %v705_v3 }
 0x171   : > { %755 = vadd.xlane.f32.xlu0 %v754_v26 }
 0x172   : > { %551 = vperm.xlu1 %1403, %v1689_v19  }
 0x174   : > { %v440_v19 = vpop.permute.xlu1 %439 }
 0x175   : > { %v1909_v0 = vpop.eup %1414 }
 0x176   : > { %v772_v45 = vsel %vm747_vm0, %v1909_v0, 0.0  ;;  %v1915_v50 = vpop.eup %1416 }
 0x177   : > { %v781_v56 = vsel %vm747_vm0, %v1915_v50, 0.0 }
 0x178   : > { %1406 = vset.pattern.permute.xlu2 %v1653_v6 }
 0x179   : > { %773 = vadd.xlane.f32.xlu0 %v772_v45 }
 0x17a   : > { %1405 = vset.pattern.permute.xlu1 %v1636_v1  ;;  %v1927_v39 = vpop.permute.xlu2 %476 }
 0x180   : > { %570 = vperm.xlu2 %1406, %v1703_v22  }
 0x181   : > { %782 = vadd.xlane.f32.xlu0 %v781_v56 }
 0x182   : > { %564 = vperm.xlu1 %1405, %v1703_v22  }
 0x184   : > { %v458_v18 = vpop.permute.xlu1 %457 }
 0x188   : > { %1409 = vset.pattern.permute.xlu2 %v1636_v1 }
 0x18a   : > { %1408 = vset.pattern.permute.xlu1 %v1660_v9  ;;  %v1933_v1 = vpop.permute.xlu2 %495 }
 0x190   : > { %589 = vperm.xlu2 %1409, %v1732_v32  }
 0x192   : > { %582 = vperm.xlu1 %1408, %v1703_v22  }
 0x194   : > { %v1931_v10 = vpop.permute.xlu1 %470 }
 0x198   : > { %1411 = vset.pattern.permute.xlu2 %v1642_v2  ;;  %v633_v2 = vmul.f32 %v1774_v46, %v1787_v51  ;;  %v623_v51 = vmul.f32 %v1796_v53, %v1758_v41  ;;  %v639_v41 = vmul.f32 %v1796_v53, %v1818_v61  ;;  %v642_v61 = vmul.f32 %v1863_v21, %v1892_v62 }
 0x19a   : > { %1410 = vset.pattern.permute.xlu1 %v1653_v6  ;;  %v1937_v43 = vpop.permute.xlu2 %507  ;;  %v655_v45 = vsub.f32 %v623_v51, %v440_v19 }
 0x1a0   : > { %601 = vperm.xlu2 %1411, %v1732_v32  }
 0x1a2   : > { %595 = vperm.xlu1 %1410, %v1732_v32   ;;  %v685_v32 = vmul.f32 1.442695, %v652_v37  ;;  %v689_v37 = vmul.f32 1.442695, %v2450_v36 }
 0x1a4   : > { %v1935_v9 = vpop.permute.xlu1 %489 }
 0x1aa   : > { %v1941_v16 = vpop.permute.xlu2 %526 }
 0x1b4   : > { %v502_v22 = vpop.permute.xlu1 %501 }
 0x1b5   : > { %v665_v6 = vsub.f32 %v633_v2, %v502_v22  ;;  %v691_v2 = vmul.f32 1.442695, %v655_v45  ;;  %v2452_v45 = vsub.f32 %v1778_v47, %v1783_v49 }
 0x1b7   : > { %v711_v12 = vmul.f32 1.442695, %v665_v6  ;;  %v695_v30 = vmul.f32 1.442695, %v2452_v45 }
 0x1b9   : > { %1418 = vpow2.f32 %v711_v12 }
 0x1ba   : > { %1420 = vpow2.f32 %v685_v32  ;;  %v540_v17 = vpop.permute.xlu2 %539 }
 0x1bb   : > { %1422 = vpow2.f32 %v683_v33  ;;  %v671_v22 = vsub.f32 %v639_v41, %v540_v17  ;;  %v626_v33 = vmul.f32 %v1863_v21, %v1780_v48 }
 0x1bc   : > { %1424 = vpow2.f32 %v689_v37  ;;  %v628_v37 = vmul.f32 %v1740_v34, %v1761_v42 }
 0x1bd   : > { %v723_v12 = vmul.f32 1.442695, %v671_v22  ;;  %v658_v38 = vsub.f32 %v626_v33, %v458_v18 }
 0x1be   : > { %v660_v49 = vsub.f32 %v628_v37, %v1931_v10  ;;  %v631_v10 = vmul.f32 %v1796_v53, %v1804_v57 }
 0x1bf   : > { %v1949_v26 = vpop.eup %1418  ;;  %v697_v47 = vmul.f32 1.442695, %v658_v38 }
 0x1c0   : > { %v790_v3 = vsel %vm747_vm0, %v1949_v26, 0.0  ;;  %v1960_v20 = vpop.eup %1420 }
 0x1c1   : > { %791 = vadd.xlane.f32.xlu0 %v790_v3  ;;  %v1964_v19 = vpop.eup %1422  ;;  %v751_v59 = vsel %vm747_vm0, %v1960_v20, 0.0 }
 0x1c2   : > { %v748_v32 = vsel %vm747_vm0, %v1964_v19, 0.0  ;;  %v1977_v3 = vpop.eup %1424 }
 0x1c3   : > { %v757_v48 = vsel %vm747_vm0, %v1977_v3, 0.0 }
 0x1c4   : > { %v521_v15 = vpop.permute.xlu1 %520 }
 0x1c5   : > { %v668_v56 = vsub.f32 %v636_v35, %v521_v15 }
 0x1c7   : > { %v717_v6 = vmul.f32 1.442695, %v668_v56  ;;  %v629_v56 = vmul.f32 %v1774_v46, %v1790_v52  ;;  %v2453_v52 = vsub.f32 %v1844_v13, %v1846_v14 }
 0x1c9   : > { %1426 = vpow2.f32 %v717_v6  ;;  %752 = vadd.xlane.f32.xlu2 %v751_v59  ;;  %v661_v22 = vsub.f32 %v629_v56, %v1927_v39  ;;  %v663_v39 = vsub.f32 %v631_v10, %v1935_v9  ;;  %v634_v9 = vmul.f32 %v1863_v21, %v1808_v58 }
 0x1ca   : > { %1428 = vpow2.f32 %v691_v2  ;;  %v558_v51 = vpop.permute.xlu2 %557  ;;  %v701_v2 = vmul.f32 1.442695, %v660_v49  ;;  %v637_v58 = vmul.f32 %v1774_v46, %v1767_v44 }
 0x1cb   : > { %1430 = vpow2.f32 %v693_v24  ;;  %v674_v62 = vsub.f32 %v642_v61, %v558_v51  ;;  %v735_v24 = vmul.f32 1.442695, %v2453_v52  ;;  %v632_v61 = vmul.f32 %v1740_v34, %v1729_v31 }
 0x1cc   : > { %749 = vadd.xlane.f32.xlu1 %v748_v32  ;;  %1432 = vpow2.f32 %v723_v12  ;;  %v703_v12 = vmul.f32 1.442695, %v661_v22  ;;  %v707_v51 = vmul.f32 1.442695, %v663_v39  ;;  %v638_v22 = vmul.f32 %v1863_v21, %v1815_v60 }
 0x1cd   : > { %1434 = vpow2.f32 %v695_v30  ;;  %v729_v18 = vmul.f32 1.442695, %v674_v62  ;;  %v664_v13 = vsub.f32 %v632_v61, %v1933_v1  ;;  %v666_v30 = vsub.f32 %v634_v9, %v1937_v43 }
 0x1ce   : > { %1436 = vpow2.f32 %v697_v47  ;;  %v641_v60 = vmul.f32 %v1774_v46, %v1827_v4  ;;  %v2455_v39 = vsub.f32 %v1822_v63, %v1756_v40  ;;  %v643_v9 = vmul.f32 %v1796_v53, %v1838_v8 }
 0x1cf   : > { %v1982_v35 = vpop.eup %1426  ;;  %1438 = vpow2.f32 %v729_v18  ;;  %v709_v38 = vmul.f32 1.442695, %v664_v13  ;;  %v669_v18 = vsub.f32 %v637_v58, %v1941_v16 }
 0x1d0   : > { %v1984_v36 = vpop.eup %1428  ;;  %v799_v17 = vsel %vm747_vm0, %v1982_v35, 0.0  ;;  %1440 = vpow2.f32 %v701_v2  ;;  %v725_v61 = vmul.f32 1.442695, %v2455_v39 }
 0x1d1   : > { %758 = vadd.xlane.f32.xlu2 %v757_v48  ;;  %800 = vadd.xlane.f32.xlu0 %v799_v17  ;;  %v760_v15 = vsel %vm747_vm0, %v1984_v36, 0.0  ;;  %v1995_v41 = vpop.eup %1430  ;;  %1442 = vpow2.f32 %v735_v24  ;;  %v713_v48 = vmul.f32 1.442695, %v666_v30  ;;  %v719_v10 = vmul.f32 1.442695, %v669_v18 }
 0x1d2   : > { %v1997_v42 = vpop.eup %1432  ;;  %v763_v59 = vsel %vm747_vm0, %v1995_v41, 0.0  ;;  %1444 = vpow2.f32 %v703_v12  ;;  %v644_v30 = vmul.f32 %v1740_v34, %v1831_v5 }
 0x1d3   : > { %v2002_v6 = vpop.eup %1434  ;;  %v808_v23 = vsel %vm747_vm0, %v1997_v42, 0.0  ;;  %1446 = vpow2.f32 %v707_v51 }
 0x1d4   : > { %761 = vadd.xlane.f32.xlu1 %v760_v15  ;;  %v766_v57 = vsel %vm747_vm0, %v2002_v6, 0.0  ;;  %v2018_v32 = vpop.eup %1436  ;;  %1448 = vpow2.f32 %v709_v38  ;;  %v533_v17 = vpop.permute.xlu1 %532  ;;  %v2454_v15 = vsub.f32 %v1799_v55, %v1725_v29 }
 0x1d5   : > { %v2020_v33 = vpop.eup %1438  ;;  %v769_v31 = vsel %vm747_vm0, %v2018_v32, 0.0  ;;  %1450 = vpow2.f32 %v713_v48 }
 0x1d6   : > { %v2023_v14 = vpop.eup %1440  ;;  %v817_v45 = vsel %vm747_vm0, %v2020_v33, 0.0  ;;  %v715_v44 = vmul.f32 1.442695, %v2454_v15  ;;  %v647_v15 = vmul.f32 %v1796_v53, %v1720_v27 }
 0x1d7   : > { %v775_v1 = vsel %vm747_vm0, %v2023_v14, 0.0  ;;  %v2034_v62 = vpop.eup %1442 }
 0x1d8   : > { %v2036_v37 = vpop.eup %1444  ;;  %v826_v49 = vsel %vm747_vm0, %v2034_v62, 0.0  ;;  %1452 = vpow2.f32 %v715_v44 }
 0x1d9   : > { %764 = vadd.xlane.f32.xlu2 %v763_v59  ;;  %809 = vadd.xlane.f32.xlu0 %v808_v23  ;;  %v2040_v47 = vpop.eup %1446  ;;  %v778_v43 = vsel %vm747_vm0, %v2036_v37, 0.0  ;;  %v670_v59 = vsub.f32 %v638_v22, %v533_v17  ;;  %1454 = vpow2.f32 %v719_v10  ;;  %v646_v17 = vmul.f32 %v1863_v21, %v1835_v7 }
 0x1da   : > { %v784_v56 = vsel %vm747_vm0, %v2040_v47, 0.0  ;;  %v2052_v2 = vpop.eup %1448  ;;  %v571_v12 = vpop.permute.xlu2 %570  ;;  %v649_v7 = vmul.f32 %v1774_v46, %v1841_v11 }
 0x1db   : > { %v2056_v52 = vpop.eup %1450  ;;  %v787_v16 = vsel %vm747_vm0, %v2052_v2, 0.0  ;;  %v721_v29 = vmul.f32 1.442695, %v670_v59 }
 0x1dc   : > { %767 = vadd.xlane.f32.xlu1 %v766_v57  ;;  %v793_v55 = vsel %vm747_vm0, %v2056_v52, 0.0 }
 0x1dd   : > { %1456 = vpow2.f32 %v721_v29  ;;  %v650_v29 = vmul.f32 %v1863_v21, %v1889_v54  ;;  %v648_v21 = vmul.f32 %v1740_v34, %v1877_v28 }
 0x1de   : > { %v2062_v24 = vpop.eup %1452  ;;  %1458 = vpow2.f32 %v725_v61 }
 0x1df   : > { %v2069_v13 = vpop.eup %1454 }
 0x1e0   : > { %v802_v40 = vsel %vm747_vm0, %v2069_v13, 0.0 }
 0x1e1   : > { %770 = vadd.xlane.f32.xlu2 %v769_v31  ;;  %818 = vadd.xlane.f32.xlu0 %v817_v45  ;;  %v796_v31 = vsel %vm747_vm0, %v2062_v24, 0.0 }
 0x1e3   : > { %v2077_v63 = vpop.eup %1456 }
 0x1e4   : > { %776 = vadd.xlane.f32.xlu1 %v775_v1  ;;  %v552_v23 = vpop.permute.xlu1 %551  ;;  %v676_v1 = vsub.f32 %v644_v30, %v571_v12  ;;  %v2081_v58 = vpop.eup %1458  ;;  %v805_v48 = vsel %vm747_vm0, %v2077_v63, 0.0 }
 0x1e5   : > { %v673_v57 = vsub.f32 %v641_v60, %v552_v23 }
 0x1e7   : > { %v727_v4 = vmul.f32 1.442695, %v673_v57 }
 0x1e9   : > { %779 = vadd.xlane.f32.xlu2 %v778_v43  ;;  %827 = vadd.xlane.f32.xlu0 %v826_v49  ;;  %1460 = vpow2.f32 %v727_v4  ;;  %v733_v43 = vmul.f32 1.442695, %v676_v1  ;;  %v811_v49 = vsel %vm747_vm0, %v2081_v58, 0.0 }
 0x1ea   : > { %v590_v8 = vpop.permute.xlu2 %589 }
 0x1ec   : > { %785 = vadd.xlane.f32.xlu1 %v784_v56  ;;  %v679_v56 = vsub.f32 %v647_v15, %v590_v8 }
 0x1ee   : > { %v739_v27 = vmul.f32 1.442695, %v679_v56 }
 0x1ef   : > { %v2089_v5 = vpop.eup %1460 }
 0x1f0   : > { %v814_v23 = vsel %vm747_vm0, %v2089_v5, 0.0 }
 0x1f1   : > { %788 = vadd.xlane.f32.xlu2 %v787_v16 }
 0x1f4   : > { %794 = vadd.xlane.f32.xlu1 %v793_v55  ;;  %v565_v51 = vpop.permute.xlu1 %564  ;;  %v608_v55 = vpop.permute.xlu0 %607 }
 0x1f5   : > { %v675_v45 = vsub.f32 %v643_v9, %v565_v51  ;;  %v682_v61 = vsub.f32 %v650_v29, %v608_v55 }
 0x1f7   : > { %v731_v38 = vmul.f32 1.442695, %v675_v45  ;;  %v745_v54 = vmul.f32 1.442695, %v682_v61 }
 0x1f9   : > { %797 = vadd.xlane.f32.xlu2 %v796_v31  ;;  %1462 = vpow2.f32 %v731_v38 }
 0x1fa   : > { %1464 = vpow2.f32 %v733_v43  ;;  %v602_v22 = vpop.permute.xlu2 %601  ;;  %v2145_v43 = vld [vmem:[%s2444_s1 + $0x30] sm:$0xff] }
 0x1fb   : > { %v681_v16 = vsub.f32 %v649_v7, %v602_v22  ;;  %v2159_v22 = vld [vmem:[%s2444_s1 + $0x38] sm:$0xff] }
 0x1fc   : > { %803 = vadd.xlane.f32.xlu1 %v802_v40  ;;  %v2126_v40 = vld [vmem:[%s2444_s1 + $0x28] sm:$0xff] }
 0x1fd   : > { %v743_v39 = vmul.f32 1.442695, %v681_v16  ;;  %v957_v38 = vmul.f32 %v1960_v20, %v2126_v40  ;;  %v962_v16 = vmul.f32 %v2002_v6, %v2145_v43  ;;  %v965_v6 = vmul.f32 %v2023_v14, %v2126_v40 }
 0x1ff   : > { %v2093_v59 = vpop.eup %1462 }
 0x200   : > { %v820_v53 = vsel %vm747_vm0, %v2093_v59, 0.0  ;;  %v2103_v60 = vpop.eup %1464 }
 0x201   : > { %806 = vadd.xlane.f32.xlu2 %v805_v48  ;;  %v823_v11 = vsel %vm747_vm0, %v2103_v60, 0.0  ;;  %v991_v48 = vsel %vm747_vm0, %v957_v38, 0.0  ;;  %v969_v38 = vmul.f32 %v2052_v2, %v2126_v40 }
 0x204   : > { %v583_v18 = vpop.permute.xlu1 %582  ;;  %812 = vadd.xlane.f32.xlu1 %v811_v49  ;;  %v958_v49 = vmul.f32 %v1903_v25, %v2145_v43  ;;  %v959_v25 = vmul.f32 %v1977_v3, %v2159_v22 }
 0x205   : > { %v678_v44 = vsub.f32 %v646_v17, %v583_v18  ;;  %v2140_v17 = vld [vmem:[%s2444_s1 + $0x20] sm:$0xff] }
 0x206   : > { %v956_v20 = vmul.f32 %v1964_v19, %v2140_v17  ;;  %v960_v18 = vmul.f32 %v1984_v36, %v2140_v17  ;;  %v961_v19 = vmul.f32 %v1995_v41, %v2126_v40  ;;  %v963_v36 = vmul.f32 %v2018_v32, %v2159_v22 }
 0x207   : > { %v737_v10 = vmul.f32 1.442695, %v678_v44  ;;  %v994_v44 = vsel %vm747_vm0, %v958_v49, 0.0  ;;  %v964_v3 = vmul.f32 %v1909_v0, %v2140_v17  ;;  %v966_v41 = vmul.f32 %v2036_v37, %v2145_v43 }
 0x208   : > { %v988_v15 = vsel %vm747_vm0, %v956_v20, 0.0  ;;  %v1000_v56 = vsel %vm747_vm0, %v960_v18, 0.0  ;;  %v1003_v7 = vsel %vm747_vm0, %v961_v19, 0.0  ;;  %v1006_v32 = vsel %vm747_vm0, %v962_v16, 0.0 }
 0x209   : > { %815 = vadd.xlane.f32.xlu2 %v814_v23  ;;  %1466 = vpow2.f32 %v737_v10  ;;  %v997_v10 = vsel %vm747_vm0, %v959_v25, 0.0  ;;  %v1009_v23 = vsel %vm747_vm0, %v963_v36, 0.0  ;;  %v1012_v29 = vsel %vm747_vm0, %v964_v3, 0.0 }
 0x20a   : > { %1468 = vpow2.f32 %v739_v27  ;;  %v2456_v27 = vlaneseq  ;;  %v1018_v55 = vsel %vm747_vm0, %v966_v41, 0.0  ;;  %v968_v37 = vmul.f32 %v2040_v47, %v2140_v17 }
 0x20b   : > { %1470 = vpow2.f32 %v743_v39  ;;  %v973_v18 = vmul.f32 %v1982_v35, %v2126_v40  ;;  %v971_v25 = vmul.f32 %v2056_v52, %v2159_v22 }
 0x20c   : > { %821 = vadd.xlane.f32.xlu1 %v820_v53  ;;  %1472 = vpow2.f32 %v745_v54  ;;  %v2179_v53 = vand.u32 127, %v2456_v27 }
 0x20d   : > { %v1039_v2 = vsel %vm747_vm0, %v973_v18, 0.0  ;;  %v1033_v16 = vsel %vm747_vm0, %v971_v25, 0.0 }
 0x20e   : > { %v2185_v0 = vadd.s32 4294967288, %v2179_v53  ;;  %v2193_v54 = vadd.s32 4294967280, %v2179_v53 }
 0x20f   : > { %v2105_v46 = vpop.eup %1466 }
 0x210   : > { %v829_v12 = vsel %vm747_vm0, %v2105_v46, 0.0  ;;  %v2113_v51 = vpop.eup %1468 }
 0x211   : > { %824 = vadd.xlane.f32.xlu2 %v823_v11  ;;  %v2115_v45 = vpop.eup %1470  ;;  %v832_v4 = vsel %vm747_vm0, %v2113_v51, 0.0  ;;  %v1015_v11 = vsel %vm747_vm0, %v965_v6, 0.0 }
 0x212   : > { %v838_v34 = vsel %vm747_vm0, %v2115_v45, 0.0  ;;  %v2121_v28 = vpop.eup %1472 }
 0x213   : > { %v841_v8 = vsel %vm747_vm0, %v2121_v28, 0.0 }
 0x214   : > { %v596_v57 = vpop.permute.xlu1 %595  ;;  %830 = vadd.xlane.f32.xlu1 %v829_v12 }
 0x215   : > { %v680_v9 = vsub.f32 %v648_v21, %v596_v57  ;;  %v967_v21 = vmul.f32 %v1915_v50, %v2159_v22  ;;  %v1024_v57 = vsel %vm747_vm0, %v968_v37, 0.0 }
 0x217   : > { %v741_v31 = vmul.f32 1.442695, %v680_v9  ;;  %v756_v9 = vpop.xlane.xlu0 %755 }
 0x218   : > { %v884_v50 = vperm.slane %v756_v9, %v2193_v54 }
 0x219   : > { %1474 = vpow2.f32 %v741_v31  ;;  %833 = vadd.xlane.f32.xlu2 %v832_v4  ;;  %v2200_v31 = vadd.s32 4294967272, %v2179_v53  ;;  %v1021_v4 = vsel %vm747_vm0, %v967_v21, 0.0  ;;  %v975_v21 = vmul.f32 %v2077_v63, %v2159_v22 }
 0x21a   : > { %v981_v63 = vmul.f32 %v2103_v60, %v2126_v40  ;;  %v984_v60 = vmul.f32 %v2113_v51, %v2140_v17 }
 0x21b   : > { %v1045_v9 = vsel %vm747_vm0, %v975_v21, 0.0 }
 0x21c   : > { %839 = vadd.xlane.f32.xlu1 %v838_v34 }
 0x21f   : > { %v2128_v30 = vpop.eup %1474  ;;  %v2229_v3 = vpop.xlane.xlu0 %773 }
 0x220   : > { %v835_v1 = vsel %vm747_vm0, %v2128_v30, 0.0 }
 0x221   : > { %836 = vadd.xlane.f32.xlu0 %v835_v1  ;;  %842 = vadd.xlane.f32.xlu2 %v841_v8  ;;  %v970_v1 = vmul.f32 %v1949_v26, %v2145_v43 }
 0x224   : > { %992 = vadd.xlane.f32.xlu1 %v991_v48 }
 0x229   : > { %989 = vadd.xlane.f32.xlu0 %v988_v15  ;;  %995 = vadd.xlane.f32.xlu2 %v994_v44  ;;  %v1027_v15 = vsel %vm747_vm0, %v969_v38, 0.0  ;;  %v1030_v44 = vsel %vm747_vm0, %v970_v1, 0.0  ;;  %v1063_v1 = vsel %vm747_vm0, %v981_v63, 0.0 }
 0x22c   : > { %1001 = vadd.xlane.f32.xlu1 %v1000_v56  ;;  %v972_v56 = vmul.f32 %v2062_v24, %v2140_v17 }
 0x231   : > { %998 = vadd.xlane.f32.xlu0 %v997_v10  ;;  %1004 = vadd.xlane.f32.xlu2 %v1003_v7  ;;  %v976_v7 = vmul.f32 %v1997_v42, %v2140_v17  ;;  %v977_v42 = vmul.f32 %v2081_v58, %v2126_v40 }
 0x233   : > { %v1048_v52 = vsel %vm747_vm0, %v976_v7, 0.0  ;;  %v898_v7 = vperm.slane %v2229_v3, %v2179_v53 }
 0x234   : > { %1010 = vadd.xlane.f32.xlu1 %v1009_v23  ;;  %v1036_v23 = vsel %vm747_vm0, %v972_v56, 0.0 }
 0x239   : > { %1007 = vadd.xlane.f32.xlu0 %v1006_v32  ;;  %1013 = vadd.xlane.f32.xlu2 %v1012_v29  ;;  %v974_v32 = vmul.f32 %v2069_v13, %v2145_v43 }
 0x23b   : > { %v1042_v13 = vsel %vm747_vm0, %v974_v32, 0.0 }
 0x23c   : > { %1019 = vadd.xlane.f32.xlu1 %v1018_v55  ;;  %v753_v39 = vpop.xlane.xlu2 %752 }
 0x23d   : > { %v880_v14 = vperm.slane %v753_v39, %v2185_v0  ;;  %v978_v39 = vmul.f32 %v2089_v5, %v2145_v43  ;;  %v980_v5 = vmul.f32 %v2093_v59, %v2140_v17  ;;  %v982_v59 = vmul.f32 %v2034_v62, %v2145_v43 }
 0x23e   : > { %v983_v62 = vmul.f32 %v2105_v46, %v2159_v22  ;;  %v986_v46 = vmul.f32 %v2115_v45, %v2145_v43 }
 0x23f   : > { %v750_v61 = vpop.xlane.xlu1 %749  ;;  %v1054_v58 = vsel %vm747_vm0, %v978_v39, 0.0 }
 0x240   : > { %v878_v12 = vperm.slane %v750_v61, %v2179_v53  ;;  %v1051_v61 = vsel %vm747_vm0, %v977_v42, 0.0 }
 0x241   : > { %1016 = vadd.xlane.f32.xlu0 %v1015_v11  ;;  %1025 = vadd.xlane.f32.xlu2 %v1024_v57  ;;  %v979_v57 = vmul.f32 %v2020_v33, %v2159_v22  ;;  %v985_v33 = vmul.f32 %v2128_v30, %v2126_v40  ;;  %v987_v40 = vmul.f32 %v2121_v28, %v2159_v22  ;;  %v1072_v30 = vsel %vm747_vm0, %v984_v60, 0.0 }
 0x242   : > { %v882_v47 = vsel %vm881_vm1, %v880_v14, %v878_v12  ;;  %v2254_v14 = vpop.xlane.xlu0 %782  ;;  %v1078_v22 = vsel %vm747_vm0, %v986_v46, 0.0 }
 0x243   : > { %v886_v48 = vsel %vm885_vm2, %v884_v50, %v882_v47  ;;  %v1060_v47 = vsel %vm747_vm0, %v980_v5, 0.0 }
 0x244   : > { %1022 = vadd.xlane.f32.xlu1 %v1021_v4  ;;  %v759_v34 = vpop.xlane.xlu2 %758  ;;  %v1057_v4 = vsel %vm747_vm0, %v979_v57, 0.0 }
 0x245   : > { %v888_v8 = vperm.slane %v759_v34, %v2200_v31 }
 0x247   : > { %v890_v20 = vsel %vm889_vm3, %v888_v8, %v886_v48  ;;  %v762_v49 = vpop.xlane.xlu1 %761  ;;  %v1066_v8 = vsel %vm747_vm0, %v982_v59, 0.0  ;;  %v1075_v48 = vsel %vm747_vm0, %v985_v33, 0.0 }
 0x248   : > { %v891_v19 = vperm.slane %v762_v49, %v2179_v53 }
 0x249   : > { %1028 = vadd.xlane.f32.xlu0 %v1027_v15  ;;  %1031 = vadd.xlane.f32.xlu2 %v1030_v44  ;;  %v1069_v15 = vsel %vm747_vm0, %v983_v62, 0.0  ;;  %v1081_v44 = vsel %vm747_vm0, %v987_v40, 0.0 }
 0x24a   : > { %v792_v34 = vpop.xlane.xlu0 %791 }
 0x24c   : > { %1040 = vadd.xlane.f32.xlu1 %v1039_v2  ;;  %v765_v26 = vpop.xlane.xlu2 %764  ;;  %v1558_v2 = vmov 0.0  }
 0x24d   : > { %v892_v35 = vperm.slane %v765_v26, %v2185_v0  ;;  %200 = vst.msk [vmem:[#allocation2] sm:$0xff] %vm199_vm5, %v1558_v2 }
 0x24e   : > { %201 = vst.msk [vmem:[#allocation3] sm:$0xff] %vm199_vm5, %v1558_v2 }
 0x24f   : > { %v893_v36 = vsel %vm881_vm1, %v892_v35, %v891_v19  ;;  %v768_v10 = vpop.xlane.xlu1 %767 }
 0x250   : > { %v894_v24 = vperm.slane %v768_v10, %v2193_v54 }
 0x251   : > { %1037 = vadd.xlane.f32.xlu0 %v1036_v23  ;;  %1034 = vadd.xlane.f32.xlu2 %v1033_v16 }
 0x252   : > { %v895_v27 = vsel %vm885_vm2, %v894_v24, %v893_v36  ;;  %v801_v49 = vpop.xlane.xlu0 %800 }
 0x254   : > { %1049 = vadd.xlane.f32.xlu1 %v1048_v52  ;;  %v771_v41 = vpop.xlane.xlu2 %770  ;;  %v903_v52 = vperm.slane %v2254_v14, %v2200_v31 }
 0x255   : > { %v896_v29 = vperm.slane %v771_v41, %v2200_v31  ;;  %v908_v41 = vperm.slane %v792_v34, %v2193_v54 }
 0x257   : > { %v897_v55 = vsel %vm889_vm3, %v896_v29, %v895_v27  ;;  %v2238_v6 = vpop.xlane.xlu1 %776 }
 0x258   : > { %v2243_v37 = vsel %vm940_vm4, %v897_v55, %v890_v20  ;;  %v899_v10 = vperm.slane %v2238_v6, %v2185_v0 }
 0x259   : > { %1043 = vadd.xlane.f32.xlu0 %v1042_v13  ;;  %1052 = vadd.xlane.f32.xlu2 %v1051_v61 }
 0x25a   : > { %v810_v17 = vpop.xlane.xlu0 %809  ;;  %v900_v29 = vsel %vm881_vm1, %v899_v10, %v898_v7 }
 0x25b   : > { %v919_v6 = vperm.slane %v810_v17, %v2179_v53 }
 0x25c   : > { %1055 = vadd.xlane.f32.xlu1 %v1054_v58  ;;  %v2248_v11 = vpop.xlane.xlu2 %779 }
 0x25d   : > { %v901_v45 = vperm.slane %v2248_v11, %v2193_v54  ;;  %v913_v11 = vperm.slane %v801_v49, %v2185_v0 }
 0x25f   : > { %v786_v12 = vpop.xlane.xlu1 %785  ;;  %v902_v39 = vsel %vm885_vm2, %v901_v45, %v900_v29 }
 0x260   : > { %v905_v43 = vperm.slane %v786_v12, %v2179_v53 }
 0x261   : > { %1046 = vadd.xlane.f32.xlu0 %v1045_v9  ;;  %1061 = vadd.xlane.f32.xlu2 %v1060_v47  ;;  %v904_v9 = vsel %vm889_vm3, %v903_v52, %v902_v39 }
 0x262   : > { %v819_v25 = vpop.xlane.xlu0 %818 }
 0x263   : > { %v924_v63 = vperm.slane %v819_v25, %v2200_v31 }
 0x264   : > { %1058 = vadd.xlane.f32.xlu1 %v1057_v4  ;;  %v789_v50 = vpop.xlane.xlu2 %788 }
 0x265   : > { %v906_v36 = vperm.slane %v789_v50, %v2185_v0 }
 0x267   : > { %v2265_v38 = vpop.xlane.xlu1 %794  ;;  %v907_v32 = vsel %vm881_vm1, %v906_v36, %v905_v43 }
 0x268   : > { %v910_v13 = vperm.slane %v2265_v38, %v2200_v31  ;;  %v909_v21 = vsel %vm885_vm2, %v908_v41, %v907_v32 }
 0x269   : > { %1064 = vadd.xlane.f32.xlu0 %v1063_v1  ;;  %1067 = vadd.xlane.f32.xlu2 %v1066_v8 }
 0x26a   : > { %v828_v23 = vpop.xlane.xlu0 %827  ;;  %v911_v59 = vsel %vm889_vm3, %v910_v13, %v909_v21 }
 0x26b   : > { %v929_v12 = vperm.slane %v828_v23, %v2193_v54 }
 0x26c   : > { %1076 = vadd.xlane.f32.xlu1 %v1075_v48  ;;  %v798_v20 = vpop.xlane.xlu2 %797  ;;  %v943_v48 = vsel %vm942_vm6, %v904_v9, %v2243_v37 }
 0x26d   : > { %v912_v27 = vperm.slane %v798_v20, %v2179_v53  ;;  %v945_v49 = vsel %vm944_vm7, %v911_v59, %v943_v48 }
 0x26f   : > { %v804_v18 = vpop.xlane.xlu1 %803  ;;  %v914_v47 = vsel %vm881_vm1, %v913_v11, %v912_v27 }
 0x270   : > { %v915_v61 = vperm.slane %v804_v18, %v2193_v54 }
 0x271   : > { %1073 = vadd.xlane.f32.xlu0 %v1072_v30  ;;  %1070 = vadd.xlane.f32.xlu2 %v1069_v15 }
 0x272   : > { %v916_v34 = vsel %vm885_vm2, %v915_v61, %v914_v47 }
 0x274   : > { %1082 = vadd.xlane.f32.xlu1 %v1081_v44  ;;  %v807_v51 = vpop.xlane.xlu2 %806 }
 0x275   : > { %v917_v5 = vperm.slane %v807_v51, %v2200_v31  ;;  %v609_v51 = vld [vmem:[#allocation2] sm:$0xff] }
 0x277   : > { %v813_v28 = vpop.xlane.xlu1 %812  ;;  %v918_v33 = vsel %vm889_vm3, %v917_v5, %v916_v34 }
 0x278   : > { %v920_v42 = vperm.slane %v813_v28, %v2185_v0  ;;  %v947_v30 = vsel %vm946_vm8, %v918_v33, %v945_v49 }
 0x279   : > { %1079 = vadd.xlane.f32.xlu0 %v1078_v22 }
 0x27a   : > { %v921_v57 = vsel %vm881_vm1, %v920_v42, %v919_v6 }
 0x27c   : > { %v816_v26 = vpop.xlane.xlu2 %815 }
 0x27d   : > { %v922_v55 = vperm.slane %v816_v26, %v2193_v54 }
 0x27f   : > { %v822_v56 = vpop.xlane.xlu1 %821  ;;  %v923_v4 = vsel %vm885_vm2, %v922_v55, %v921_v57 }
 0x280   : > { %v926_v3 = vperm.slane %v822_v56, %v2179_v53  ;;  %v925_v20 = vsel %vm889_vm3, %v924_v63, %v923_v4 }
 0x281   : > { %v949_v2 = vsel %vm948_vm9, %v925_v20, %v947_v30 }
 0x284   : > { %v825_v19 = vpop.xlane.xlu2 %824 }
 0x285   : > { %v927_v16 = vperm.slane %v825_v19, %v2185_v0 }
 0x287   : > { %v831_v35 = vpop.xlane.xlu1 %830  ;;  %v928_v14 = vsel %vm881_vm1, %v927_v16, %v926_v3 }
 0x288   : > { %v931_v50 = vperm.slane %v831_v35, %v2200_v31  ;;  %v930_v38 = vsel %vm885_vm2, %v929_v12, %v928_v14 }
 0x28a   : > { %v932_v18 = vsel %vm889_vm3, %v931_v50, %v930_v38 }
 0x28b   : > { %v951_v28 = vsel %vm950_vm10, %v932_v18, %v949_v2 }
 0x28c   : > { %v834_v24 = vpop.xlane.xlu2 %833 }
 0x28d   : > { %v933_v60 = vperm.slane %v834_v24, %v2179_v53 }
 0x28f   : > { %v840_v58 = vpop.xlane.xlu1 %839 }
 0x290   : > { %v936_v40 = vperm.slane %v840_v58, %v2193_v54 }
 0x294   : > { %v837_v1 = vpop.xlane.xlu0 %836  ;;  %v843_v8 = vpop.xlane.xlu2 %842 }
 0x295   : > { %v934_v62 = vperm.slane %v837_v1, %v2185_v0  ;;  %v938_v37 = vperm.slane %v843_v8, %v2200_v31 }
 0x297   : > { %v935_v15 = vsel %vm881_vm1, %v934_v62, %v933_v60  ;;  %v993_v44 = vpop.xlane.xlu1 %992 }
 0x298   : > { %v937_v46 = vsel %vm885_vm2, %v936_v40, %v935_v15  ;;  %v1117_v19 = vperm.slane %v993_v44, %v2185_v0 }
 0x299   : > { %v939_v17 = vsel %vm889_vm3, %v938_v37, %v937_v46 }
 0x29a   : > { %v953_v22 = vsel %vm952_vm11, %v939_v17, %v951_v28 }
 0x29b   : > { %v955_v26 = vadd.f32 %v953_v22, %v609_v51 }
 0x29c   : > { %v990_v56 = vpop.xlane.xlu0 %989  ;;  %v996_v25 = vpop.xlane.xlu2 %995 }
 0x29d   : > { %1182 = vst.msk [vmem:[#allocation2] sm:$0xff] %vm199_vm5, %v955_v26  ;;  %v1116_v35 = vperm.slane %v990_v56, %v2179_v53  ;;  %v1119_v36 = vperm.slane %v996_v25, %v2193_v54 }
 0x29f   : > { %v1118_v10 = vsel %vm881_vm1, %v1117_v19, %v1116_v35  ;;  %v1002_v45 = vpop.xlane.xlu1 %1001 }
 0x2a0   : > { %v1120_v43 = vsel %vm885_vm2, %v1119_v36, %v1118_v10  ;;  %v1123_v32 = vperm.slane %v1002_v45, %v2179_v53 }
 0x2a4   : > { %v999_v7 = vpop.xlane.xlu0 %998  ;;  %v1005_v23 = vpop.xlane.xlu2 %1004 }
 0x2a5   : > { %v1121_v16 = vperm.slane %v999_v7, %v2200_v31  ;;  %v1124_v41 = vperm.slane %v1005_v23, %v2185_v0 }
 0x2a7   : > { %v1122_v24 = vsel %vm889_vm3, %v1121_v16, %v1120_v43  ;;  %v1011_v52 = vpop.xlane.xlu1 %1010  ;;  %v1125_v55 = vsel %vm881_vm1, %v1124_v41, %v1123_v32 }
 0x2a8   : > { %v1128_v3 = vperm.slane %v1011_v52, %v2200_v31 }
 0x2ac   : > { %v1008_v42 = vpop.xlane.xlu0 %1007  ;;  %v1014_v29 = vpop.xlane.xlu2 %1013 }
 0x2ad   : > { %v1126_v27 = vperm.slane %v1008_v42, %v2193_v54  ;;  %v1130_v48 = vperm.slane %v1014_v29, %v2179_v53 }
 0x2af   : > { %v1127_v6 = vsel %vm885_vm2, %v1126_v27, %v1125_v55  ;;  %v1020_v39 = vpop.xlane.xlu1 %1019 }
 0x2b0   : > { %v1129_v13 = vsel %vm889_vm3, %v1128_v3, %v1127_v6  ;;  %v1133_v49 = vperm.slane %v1020_v39, %v2193_v54 }
 0x2b1   : > { %v1172_v61 = vsel %vm940_vm4, %v1129_v13, %v1122_v24 }
 0x2b4   : > { %v1017_v58 = vpop.xlane.xlu0 %1016  ;;  %v1026_v11 = vpop.xlane.xlu2 %1025 }
 0x2b5   : > { %v1131_v8 = vperm.slane %v1017_v58, %v2185_v0  ;;  %v1137_v18 = vperm.slane %v1026_v11, %v2179_v53 }
 0x2b7   : > { %v1023_v21 = vpop.xlane.xlu1 %1022  ;;  %v1132_v60 = vsel %vm881_vm1, %v1131_v8, %v1130_v48 }
 0x2b8   : > { %v1135_v40 = vperm.slane %v1023_v21, %v2200_v31  ;;  %v1134_v15 = vsel %vm885_vm2, %v1133_v49, %v1132_v60 }
 0x2ba   : > { %v1136_v35 = vsel %vm889_vm3, %v1135_v40, %v1134_v15 }
 0x2bb   : > { %v1173_v55 = vsel %vm942_vm6, %v1136_v35, %v1172_v61 }
 0x2bc   : > { %v1029_v5 = vpop.xlane.xlu0 %1028  ;;  %v1032_v14 = vpop.xlane.xlu2 %1031 }
 0x2bd   : > { %v1138_v62 = vperm.slane %v1029_v5, %v2185_v0  ;;  %v1140_v37 = vperm.slane %v1032_v14, %v2193_v54 }
 0x2bf   : > { %v1041_v12 = vpop.xlane.xlu1 %1040  ;;  %v1139_v51 = vsel %vm881_vm1, %v1138_v62, %v1137_v18 }
 0x2c0   : > { %v1145_v26 = vperm.slane %v1041_v12, %v2185_v0  ;;  %v1141_v43 = vsel %vm885_vm2, %v1140_v37, %v1139_v51  ;;  %v610_v12 = vld [vmem:[#allocation3] sm:$0xff] }
 0x2c4   : > { %v1038_v57 = vpop.xlane.xlu0 %1037  ;;  %v1035_v9 = vpop.xlane.xlu2 %1034 }
 0x2c5   : > { %v1144_v44 = vperm.slane %v1038_v57, %v2179_v53  ;;  %v1142_v46 = vperm.slane %v1035_v9, %v2200_v31 }
 0x2c7   : > { %v1050_v47 = vpop.xlane.xlu1 %1049  ;;  %v1146_v7 = vsel %vm881_vm1, %v1145_v26, %v1144_v44  ;;  %v1143_v24 = vsel %vm889_vm3, %v1142_v46, %v1141_v43 }
 0x2c8   : > { %v1151_v36 = vperm.slane %v1050_v47, %v2179_v53  ;;  %v1174_v58 = vsel %vm944_vm7, %v1143_v24, %v1173_v55 }
 0x2cc   : > { %v1044_v4 = vpop.xlane.xlu0 %1043  ;;  %v1053_v50 = vpop.xlane.xlu2 %1052 }
 0x2cd   : > { %v1147_v28 = vperm.slane %v1044_v4, %v2193_v54  ;;  %v1152_v17 = vperm.slane %v1053_v50, %v2185_v0 }
 0x2cf   : > { %v1056_v63 = vpop.xlane.xlu1 %1055  ;;  %v1148_v52 = vsel %vm885_vm2, %v1147_v28, %v1146_v7  ;;  %v1153_v41 = vsel %vm881_vm1, %v1152_v17, %v1151_v36 }
 0x2d0   : > { %v1154_v56 = vperm.slane %v1056_v63, %v2193_v54 }
 0x2d2   : > { %v1155_v42 = vsel %vm885_vm2, %v1154_v56, %v1153_v41 }
 0x2d4   : > { %v1047_v59 = vpop.xlane.xlu0 %1046  ;;  %v1062_v34 = vpop.xlane.xlu2 %1061 }
 0x2d5   : > { %v1149_v25 = vperm.slane %v1047_v59, %v2200_v31  ;;  %v1158_v19 = vperm.slane %v1062_v34, %v2179_v53 }
 0x2d7   : > { %v1059_v38 = vpop.xlane.xlu1 %1058  ;;  %v1150_v29 = vsel %vm889_vm3, %v1149_v25, %v1148_v52 }
 0x2d8   : > { %v1156_v10 = vperm.slane %v1059_v38, %v2200_v31  ;;  %v1175_v21 = vsel %vm946_vm8, %v1150_v29, %v1174_v58 }
 0x2da   : > { %v1157_v3 = vsel %vm889_vm3, %v1156_v10, %v1155_v42 }
 0x2db   : > { %v1176_v14 = vsel %vm948_vm9, %v1157_v3, %v1175_v21 }
 0x2dc   : > { %v1065_v33 = vpop.xlane.xlu0 %1064  ;;  %v1068_v1 = vpop.xlane.xlu2 %1067 }
 0x2dd   : > { %v1159_v2 = vperm.slane %v1065_v33, %v2185_v0  ;;  %v1161_v45 = vperm.slane %v1068_v1, %v2193_v54 }
 0x2df   : > { %v1077_v20 = vpop.xlane.xlu1 %1076  ;;  %v1160_v23 = vsel %vm881_vm1, %v1159_v2, %v1158_v19 }
 0x2e0   : > { %v1162_v6 = vsel %vm885_vm2, %v1161_v45, %v1160_v23  ;;  %v1166_v39 = vperm.slane %v1077_v20, %v2185_v0 }
 0x2e4   : > { %v1074_v30 = vpop.xlane.xlu0 %1073  ;;  %v1071_v22 = vpop.xlane.xlu2 %1070 }
 0x2e5   : > { %v1163_v16 = vperm.slane %v1071_v22, %v2200_v31  ;;  %v1165_v32 = vperm.slane %v1074_v30, %v2179_v53 }
 0x2e7   : > { %v1083_v27 = vpop.xlane.xlu1 %1082  ;;  %v1164_v53 = vsel %vm889_vm3, %v1163_v16, %v1162_v6  ;;  %v1167_v5 = vsel %vm881_vm1, %v1166_v39, %v1165_v32 }
 0x2e8   : > { %v1170_v61 = vperm.slane %v1083_v27, %v2200_v31  ;;  %v1177_v0 = vsel %vm950_vm10, %v1164_v53, %v1176_v14 }
 0x2ec   : > { %v1080_v13 = vpop.xlane.xlu0 %1079 }
 0x2ed   : > { %v1168_v11 = vperm.slane %v1080_v13, %v2193_v54  ;;  %v1187_v54 = vld [vmem:[#allocation2] sm:$0xff] }
 0x2ee   : > { %1476 = vrcp.f32 %v1187_v54 }
 0x2ef   : > { %v1169_v57 = vsel %vm885_vm2, %v1168_v11, %v1167_v5 }
 0x2f0   : > { %v1171_v9 = vsel %vm889_vm3, %v1170_v61, %v1169_v57 }
 0x2f1   : > { %v1178_v47 = vsel %vm952_vm11, %v1171_v9, %v1177_v0 }
 0x2f2   : > { %v1180_v4 = vadd.f32 %v1178_v47, %v610_v12 }
 0x2f4   : > { %1183 = vst.msk [vmem:[#allocation3] sm:$0xff] %vm199_vm5, %v1180_v4  ;;  %v1477_v31 = vpop.eup %1476 }
 0x2fb   : > { %v1189_v50 = vld [vmem:[#allocation3] sm:$0xff] }
 0x2fc   : > { %v1190_v63 = vmul.f32 %v1477_v31, %v1189_v50 }
 0x2fe   : > { %1191 = vst.msk [vmem:[%s186_s11] sm:$0xff] %vm199_vm5, %v1190_v63 }
 0x2ff   : > { %1505 = shalt.err (!%p1502_p5)
}
 0x300   : > { %1302 = dma.vmem_to_hbm [thread:$0]  (%p1619_p4), %s1206_s18, 128, %s1208_s19, %s1193_s21  }
 0x301 PF: > { %p1308_p6 = scmp.ge.s32.totalorder %s1556_s17, 2  ;;  %s1219_s4 = sand.u32 1, %s1536_s12  }
 0x302   : > { %s1220_s5 = scalar_lea.sflag [#allocation5], %s1219_s4 }
 0x303   : > { %p1305_p7 = pnand %p1308_p6, %p1626_p8 }
 0x305   : > { %p1306_p9 = pneg %p1305_p7 }
 0x307   : > { %1531 = dma.done.wait (%p1306_p9), %s1220_s5, 128  }
 0x308   : > { %1533 = vsyncadd (%p1306_p9), %s1220_s5, 4294967168  ;;  %s16_s17 = sadd.s32 1, %s1556_s17   ;;  %s2457_s12 = smov %s1540_s13 }
 0x309   : > { %p13_p10 = scmp.ge.s32.totalorder %s16_s17, 4   ;;  %s2458_s13 = smov %s1544_s14 }
 0x30a   : > { %s2459_s14 = smov %s1632_s25  ;;  %s2460_s15 = smov %s1552_s16 }
 0x30b   : > { %s2461_s16 = smov %s2463_s20  ;;  %15 = sbr.rel (!%p13_p10) target bundleno = 4 (0x4), region = 78 }
 0x310   :  { %1226 = vsyncpa [#allocation5], 1 }
 0x311   :  { %1228 = vsyncpa [#allocation5 + $0x1], 1 }

</bundles_post_ra>
